<compile_context>
chip_gen: v7x
topology: tpu7x:2x2x1
jax: 0.10.0
libtpu: 0.0.40
codegen_flags: <defaults>
</compile_context>

<pallas_src>
import functools

import jax
import jax.numpy as jnp
from jax.experimental import pallas as pl
from jax.experimental.pallas import tpu as pltpu

HIDDEN = 100            # DDC hidden width (nn.Linear(input_dim, 100))
HIDDEN_PAD = 128        # lane-dense padded hidden width
CLASS_PAD = 128         # lane-dense padded cluster width
BN_EPS = 1e-5
NEG_INF = -1e30         # masks padded logit lanes out of the softmax
VMEM_LIMIT_BYTES = 32 * 1024 * 1024   # explicit; within v7x's 64 MiB physical VMEM


# --------------------------------------------------------------------------- #
# Pass 1: fused = sum_j c_j * z_j ; h = ReLU(fused @ W1 + b1); BN partial stats
# --------------------------------------------------------------------------- #
def _fuse_hidden_kernel(n_z, n_rows, tm, scal_ref, *refs):
    z_refs = refs[:n_z]
    w1_ref, b1_ref = refs[n_z], refs[n_z + 1]
    h_ref, stats_ref = refs[n_z + 2], refs[n_z + 3]

    # Weighted-mean fusion: both WeightedMean modules + the gate folded into a
    # single coefficient per feature tensor (SMEM scalars).  Inputs are bf16
    # storage -> upcast immediately, keep the arithmetic in f32 (v5e VALU).
    fused = scal_ref[0] * z_refs[0][...].astype(jnp.float32)
    for j in range(1, n_z):
        fused = fused + scal_ref[j] * z_refs[j][...].astype(jnp.float32)

    # bf16 MXU matmul, f32 accumulate.  W1 columns >= HIDDEN and b1 padding are
    # zero, so padded lanes of h are exactly 0.
    h = jnp.dot(fused.astype(jnp.bfloat16), w1_ref[...],
                preferred_element_type=jnp.float32)
    h = jnp.maximum(h + b1_ref[...], 0.0)
    h_ref[...] = h.astype(jnp.bfloat16)                      # bf16 inter-pass store

    # Per-tile BatchNorm partials, pre-scaled by 1/n so pass 2 only sums them.
    # Mask out-of-range rows of a (possibly partial) tail tile.
    if n_rows % tm != 0:
        row = (jax.lax.broadcasted_iota(jnp.int32, h.shape, 0)
               + pl.program_id(0) * tm)
        h = jnp.where(row < n_rows, h, 0.0)
    inv_n = scal_ref[n_z]
    s1 = jnp.sum(h, axis=0, keepdims=True) * inv_n           # (1, 128) mean part
    s2 = jnp.sum(h * h, axis=0, keepdims=True) * inv_n       # (1, 128) E[h^2] part
    stats_ref[...] = jnp.concatenate([s1, s2], axis=0)[None]  # (1, 2, 128)


# --------------------------------------------------------------------------- #
# Pass 2: cross-tile BN reduce + affine ; out = softmax(hidden @ W2 + b2)
# --------------------------------------------------------------------------- #
def _bn_softmax_kernel(h_ref, stats_ref, p2_ref, w2_ref, out_ref, hid_ref):
    # Tiny cross-tile reduction (redundant per tile, hidden under the h DMA):
    # exact full-batch mean / biased variance, eps=1e-5 (PyTorch training BN).
    tot = jnp.sum(stats_ref[...], axis=0)                    # (2, 128)
    mean = tot[0:1, :]
    # NOTE: E[h^2] - mean^2 in f32; safe here (ReLU activations, O(1) scale).
    var = jnp.maximum(tot[1:2, :] - mean * mean, 0.0)
    gamma, beta, b2m = p2_ref[0:1, :], p2_ref[1:2, :], p2_ref[2:3, :]
    scale = jax.lax.rsqrt(var + BN_EPS) * gamma              # BN affine folded
    shift = beta - mean * scale

    hidden = h_ref[...].astype(jnp.float32) * scale + shift  # f32 elementwise
    hid_ref[...] = hidden                                    # (TM, 128) f32

    logits = jnp.dot(hidden.astype(jnp.bfloat16), w2_ref[...],
                     preferred_element_type=jnp.float32) + b2m
    m = jnp.max(logits, axis=1, keepdims=True)
    e = jnp.exp(logits - m)                                  # padded lanes -> 0
    denom = jnp.sum(e, axis=1, keepdims=True)
    out_ref[...] = e * pl.reciprocal(denom, approx=True)     # EUP reciprocal


def _pick_tile(n, d, n_z):
    """Batch tile: largest multiple of 128 whose pass-1 VMEM streams
    (double-buffered bf16 z inputs + bf16 h output + in-kernel f32/bf16 temps)
    fit a ~3/4 * vmem_limit budget, capped at 1024 and at n//2 so the
    'parallel' grid axis keeps >= 2 tiles (v7x megacore / both TCs).
    Tiny batches (n <= 128) use one full-batch block."""
    if n <= 128:
        return n
    per_row = (2 * n_z * d * 2          # double-buffered bf16 z streams
               + d * (4 + 2)            # f32 fused + bf16 matmul-operand temps
               + 2 * HIDDEN_PAD * 2     # double-buffered bf16 h output stream
               + HIDDEN_PAD * 4)        # f32 h temp
    weights = 2 * (d * HIDDEN_PAD * 2 + HIDDEN_PAD * CLASS_PAD * 2) + (1 << 16)
    budget = (VMEM_LIMIT_BYTES * 3) // 4
    tm = max(128, min(1024, ((budget - weights) // per_row) // 128 * 128))
    return min(tm, max(128, (n // 2) // 128 * 128))


def dsmvc_forward(zs_old, zs_new, single, params):
    """Pallas version of DSMVCLarge.forward after the ConvNet encoders.

    fused = gate([wmean(zs_old), wmean(zs_new), single]); output, hidden = DDC(fused)
    Returns (zs_old, zs_new, output, hidden) like the PyTorch module."""
    z_list = list(zs_old) + list(zs_new) + [single]
    n_z = len(z_list)
    n, d = z_list[0].shape
    k = params["w2"].shape[1]

    # Fold the nested softmax-weighted means + gate into one coefficient per
    # feature tensor; append 1/n for the BN partial-sum scaling.  Lives in SMEM.
    g = jax.nn.softmax(params["gate_w"])
    a = jax.nn.softmax(params["fuse_old_w"])
    b = jax.nn.softmax(params["fuse_new_w"])
    scal = jnp.concatenate(
        [g[0] * a, g[1] * b, g[2:3],
         jnp.full((1,), 1.0 / n, jnp.float32)]).astype(jnp.float32)

    # Lane-dense (128-padded) params; matmul weights pre-cast to bf16.
    w1_p = (jnp.zeros((d, HIDDEN_PAD), jnp.float32)
            .at[:, :HIDDEN].set(params["w1"]).astype(jnp.bfloat16))
    b1_p = jnp.zeros((1, HIDDEN_PAD), jnp.float32).at[0, :HIDDEN].set(params["b1"])
    w2_p = (jnp.zeros((HIDDEN_PAD, CLASS_PAD), jnp.float32)
            .at[:HIDDEN, :k].set(params["w2"]).astype(jnp.bfloat16))
    # packed (8,128) pass-2 params: row0 gamma | row1 beta | row2 b2 (-1e30 pad)
    p2 = jnp.zeros((8, HIDDEN_PAD), jnp.float32)
    p2 = p2.at[0, :HIDDEN].set(params["gamma"])
    p2 = p2.at[1, :HIDDEN].set(params["beta"])
    p2 = p2.at[2].set(NEG_INF)
    p2 = p2.at[2, :k].set(params["b2"])

    tm = _pick_tile(n, d, n_z)
    n_tiles = pl.cdiv(n, tm)
    cparams = pltpu.CompilerParams(dimension_semantics=("parallel",),
                                   vmem_limit_bytes=VMEM_LIMIT_BYTES)

    # ---------------- pass 1: fusion + Linear + ReLU + BN partials ----------
    zb = z_list[0].dtype.itemsize
    cost1 = pl.CostEstimate(
        flops=int(2 * n * d * (n_z + HIDDEN_PAD) + 6 * n * HIDDEN_PAD),
        transcendentals=0,
        bytes_accessed=int(zb * n * d * n_z + 2 * d * HIDDEN_PAD
                           + 2 * n * HIDDEN_PAD + 8 * n_tiles * HIDDEN_PAD))
    z_spec = pl.BlockSpec((tm, d), lambda i: (i, 0))
    const2 = lambda i: (0, 0)
    h_full, stats = pl.pallas_call(
        functools.partial(_fuse_hidden_kernel, n_z, n, tm),
        grid=(n_tiles,),
        in_specs=([pl.BlockSpec(memory_space=pltpu.MemorySpace.SMEM)]   # coef+1/n
                  + [z_spec] * n_z
                  + [pl.BlockSpec((d, HIDDEN_PAD), const2),             # W1 (bf16)
                     pl.BlockSpec((1, HIDDEN_PAD), const2)]),           # b1
        out_specs=(pl.BlockSpec((tm, HIDDEN_PAD), lambda i: (i, 0)),
                   pl.BlockSpec((1, 2, HIDDEN_PAD), lambda i: (i, 0, 0))),
        out_shape=(jax.ShapeDtypeStruct((n, HIDDEN_PAD), jnp.bfloat16),
                   jax.ShapeDtypeStruct((n_tiles, 2, HIDDEN_PAD), jnp.float32)),
        compiler_params=cparams,
        cost_estimate=cost1,
    )(scal, *z_list, w1_p, b1_p)

    # ---------------- pass 2: BN reduce+apply + Linear + Softmax ------------
    cost2 = pl.CostEstimate(
        flops=int(2 * n * HIDDEN_PAD * CLASS_PAD + 12 * n * HIDDEN_PAD),
        transcendentals=int(n * CLASS_PAD + n + n_tiles * HIDDEN_PAD),
        bytes_accessed=int(2 * n * HIDDEN_PAD + 4 * n * (CLASS_PAD + HIDDEN_PAD)
                           + 2 * HIDDEN_PAD * CLASS_PAD
                           + 4 * (2 * n_tiles + 8) * HIDDEN_PAD))
    out_full, hid_full = pl.pallas_call(
        _bn_softmax_kernel,
        grid=(n_tiles,),
        in_specs=[pl.BlockSpec((tm, HIDDEN_PAD), lambda i: (i, 0)),           # h bf16
                  pl.BlockSpec((n_tiles, 2, HIDDEN_PAD), lambda i: (0, 0, 0)),# stats
                  pl.BlockSpec((8, HIDDEN_PAD), const2),                      # packed
                  pl.BlockSpec((HIDDEN_PAD, CLASS_PAD), const2)],             # W2 bf16
        out_specs=(pl.BlockSpec((tm, CLASS_PAD), lambda i: (i, 0)),
                   pl.BlockSpec((tm, HIDDEN_PAD), lambda i: (i, 0))),
        out_shape=(jax.ShapeDtypeStruct((n, CLASS_PAD), jnp.float32),
                   jax.ShapeDtypeStruct((n, HIDDEN_PAD), jnp.float32)),
        compiler_params=cparams,
        cost_estimate=cost2,
    )(h_full, stats, p2, w2_p)

    output = out_full[:, :k]          # slice padded lanes off in the wrapper
    hidden = hid_full[:, :HIDDEN]
    return zs_old, zs_new, output, hidden


# --------------------------------------------------------------------------- #
# Parameter init mimicking the PyTorch module (he_init on Linear weights,
# nn.Linear default uniform biases, BN weight=1/bias=0, fusion weights=1/n).
# --------------------------------------------------------------------------- #
def init_params(key, view_old, view_new, feature_dim, class_num):
    k1, k2, k3, k4 = jax.random.split(key, 4)
    lim1 = 1.0 / jnp.sqrt(feature_dim)
    lim2 = 1.0 / jnp.sqrt(HIDDEN)
    return {
        "fuse_old_w": jnp.full((view_old,), 1.0 / view_old, jnp.float32),
        "fuse_new_w": jnp.full((view_new,), 1.0 / view_new, jnp.float32),
        "gate_w": jnp.full((3,), 1.0 / 3.0, jnp.float32),
        # stored (in, out) so kernels compute x @ W
        "w1": jax.random.normal(k1, (feature_dim, HIDDEN), jnp.float32)
              * jnp.sqrt(2.0 / feature_dim),
        "b1": jax.random.uniform(k2, (HIDDEN,), jnp.float32, -lim1, lim1),
        "gamma": jnp.ones((HIDDEN,), jnp.float32),
        "beta": jnp.zeros((HIDDEN,), jnp.float32),
        "w2": jax.random.normal(k3, (HIDDEN, class_num), jnp.float32)
              * jnp.sqrt(2.0 / HIDDEN),
        "b2": jax.random.uniform(k4, (class_num,), jnp.float32, -lim2, lim2),
    }


def reference_forward(zs_old, zs_new, single, params):
    """Pure-JAX f32 reference of the same post-encoder forward pass."""
    f32 = lambda t: t.astype(jnp.float32)
    a = jax.nn.softmax(params["fuse_old_w"])
    b = jax.nn.softmax(params["fuse_new_w"])
    g = jax.nn.softmax(params["gate_w"])
    fused_old = sum(a[v] * f32(zs_old[v]) for v in range(len(zs_old)))
    fused_new = sum(b[v] * f32(zs_new[v]) for v in range(len(zs_new)))
    fused = g[0] * fused_old + g[1] * fused_new + g[2] * f32(single)
    h = jnp.maximum(fused @ params["w1"] + params["b1"], 0.0)
    mean = jnp.mean(h, axis=0)
    var = jnp.mean((h - mean) ** 2, axis=0)          # biased (training-mode BN)
    hidden = (h - mean) * jax.lax.rsqrt(var + BN_EPS) * params["gamma"] + params["beta"]
    logits = hidden @ params["w2"] + params["b2"]
    return jax.nn.softmax(logits, axis=1), hidden


if __name__ == "__main__":
    key = jax.random.PRNGKey(0)
    view_old, view_new = 2, 3
    batch, feature_dim, class_num = 256, 128, 10     # -> TM=128, 2-tile parallel grid

    k_z, k_p = jax.random.split(key)
    zkeys = jax.random.split(k_z, view_old + view_new + 1)
    # TODO(synk): ConvNet encoders not implemented in Pallas — synthesize their
    # flattened bf16 feature outputs here (bf16 at the encoder boundary halves
    # the dominant HBM read of the fusion kernel; no extra cast in the wrapper).
    mk = lambda kk: jax.random.normal(kk, (batch, feature_dim),
                                      jnp.float32).astype(jnp.bfloat16)
    zs_old = tuple(mk(zkeys[v]) for v in range(view_old))
    zs_new = tuple(mk(zkeys[view_old + v]) for v in range(view_new))
    single = mk(zkeys[-1])
    params = init_params(k_p, view_old, view_new, feature_dim, class_num)

    fwd = jax.jit(dsmvc_forward)
    _, _, output, hidden = fwd(zs_old, zs_new, single, params)
    jax.block_until_ready((output, hidden))

    assert output.shape == (batch, class_num)
    assert hidden.shape == (batch, HIDDEN)
    # softmax rows sum to ~1 (approx reciprocal + bf16 matmul tolerance)
    assert jnp.allclose(jnp.sum(output, axis=1), 1.0, atol=2e-2)

    out_ref, hid_ref = reference_forward(zs_old, zs_new, single, params)
    assert float(jnp.max(jnp.abs(output - out_ref))) < 7e-2
    assert float(jnp.max(jnp.abs(hidden - hid_ref))) < 2.5e-1

    print("KERNEL_OK")
</pallas_src>

<mosaic_0001>
module attributes {stable_mosaic.version = 11 : i64} {
  func.func @_fuse_hidden_kernel(%arg0: i32, %arg1: memref<7xf32, #tpu.memory_space<smem>>, %arg2: memref<128x128xbf16, #tpu.memory_space<vmem>>, %arg3: memref<128x128xbf16, #tpu.memory_space<vmem>>, %arg4: memref<128x128xbf16, #tpu.memory_space<vmem>>, %arg5: memref<128x128xbf16, #tpu.memory_space<vmem>>, %arg6: memref<128x128xbf16, #tpu.memory_space<vmem>>, %arg7: memref<128x128xbf16, #tpu.memory_space<vmem>>, %arg8: memref<128x128xbf16, #tpu.memory_space<vmem>>, %arg9: memref<1x128xf32, #tpu.memory_space<vmem>>, %arg10: memref<128x128xbf16, #tpu.memory_space<vmem>>, %arg11: memref<1x2x128xf32, #tpu.memory_space<vmem>>) attributes {dimension_semantics = [#tpu.dimension_semantics<parallel>], iteration_bounds = array<i64: 2>, scalar_prefetch = 0 : i64, scratch_operands = 0 : i64, tpu.core_type = #tpu.core_type<tc>, window_params = [{transform_indices = @transform_0, window_bounds = array<i64: 7>}, {transform_indices = @transform_1, window_bounds = array<i64: 128, 128>}, {transform_indices = @transform_2, window_bounds = array<i64: 128, 128>}, {transform_indices = @transform_3, window_bounds = array<i64: 128, 128>}, {transform_indices = @transform_4, window_bounds = array<i64: 128, 128>}, {transform_indices = @transform_5, window_bounds = array<i64: 128, 128>}, {transform_indices = @transform_6, window_bounds = array<i64: 128, 128>}, {pipeline_mode = #tpu.pipeline_mode<synchronous>, transform_indices = @transform_7, window_bounds = array<i64: 128, 128>}, {pipeline_mode = #tpu.pipeline_mode<synchronous>, transform_indices = @transform_8, window_bounds = array<i64: 1, 128>}, {transform_indices = @transform_9, window_bounds = array<i64: 128, 128>}, {transform_indices = @transform_10, window_bounds = array<i64: 1, 2, 128>}]} {
    %c0 = arith.constant 0 : index
    %0 = memref.load %arg1[%c0] : memref<7xf32, #tpu.memory_space<smem>>
    %c0_0 = arith.constant 0 : index
    %c0_1 = arith.constant 0 : index
    %1 = vector.load %arg2[%c0_0, %c0_1] : memref<128x128xbf16, #tpu.memory_space<vmem>>, vector<128x128xbf16>
    %2 = arith.extf %1 : vector<128x128xbf16> to vector<128x128xf32>
    %3 = vector.broadcast %0 : f32 to vector<128x128xf32>
    %4 = arith.mulf %3, %2 : vector<128x128xf32>
    %c1 = arith.constant 1 : index
    %5 = memref.load %arg1[%c1] : memref<7xf32, #tpu.memory_space<smem>>
    %c0_2 = arith.constant 0 : index
    %c0_3 = arith.constant 0 : index
    %6 = vector.load %arg3[%c0_2, %c0_3] : memref<128x128xbf16, #tpu.memory_space<vmem>>, vector<128x128xbf16>
    %7 = arith.extf %6 : vector<128x128xbf16> to vector<128x128xf32>
    %8 = vector.broadcast %5 : f32 to vector<128x128xf32>
    %9 = arith.mulf %8, %7 : vector<128x128xf32>
    %10 = arith.addf %4, %9 : vector<128x128xf32>
    %c2 = arith.constant 2 : index
    %11 = memref.load %arg1[%c2] : memref<7xf32, #tpu.memory_space<smem>>
    %c0_4 = arith.constant 0 : index
    %c0_5 = arith.constant 0 : index
    %12 = vector.load %arg4[%c0_4, %c0_5] : memref<128x128xbf16, #tpu.memory_space<vmem>>, vector<128x128xbf16>
    %13 = arith.extf %12 : vector<128x128xbf16> to vector<128x128xf32>
    %14 = vector.broadcast %11 : f32 to vector<128x128xf32>
    %15 = arith.mulf %14, %13 : vector<128x128xf32>
    %16 = arith.addf %10, %15 : vector<128x128xf32>
    %c3 = arith.constant 3 : index
    %17 = memref.load %arg1[%c3] : memref<7xf32, #tpu.memory_space<smem>>
    %c0_6 = arith.constant 0 : index
    %c0_7 = arith.constant 0 : index
    %18 = vector.load %arg5[%c0_6, %c0_7] : memref<128x128xbf16, #tpu.memory_space<vmem>>, vector<128x128xbf16>
    %19 = arith.extf %18 : vector<128x128xbf16> to vector<128x128xf32>
    %20 = vector.broadcast %17 : f32 to vector<128x128xf32>
    %21 = arith.mulf %20, %19 : vector<128x128xf32>
    %22 = arith.addf %16, %21 : vector<128x128xf32>
    %c4 = arith.constant 4 : index
    %23 = memref.load %arg1[%c4] : memref<7xf32, #tpu.memory_space<smem>>
    %c0_8 = arith.constant 0 : index
    %c0_9 = arith.constant 0 : index
    %24 = vector.load %arg6[%c0_8, %c0_9] : memref<128x128xbf16, #tpu.memory_space<vmem>>, vector<128x128xbf16>
    %25 = arith.extf %24 : vector<128x128xbf16> to vector<128x128xf32>
    %26 = vector.broadcast %23 : f32 to vector<128x128xf32>
    %27 = arith.mulf %26, %25 : vector<128x128xf32>
    %28 = arith.addf %22, %27 : vector<128x128xf32>
    %c5 = arith.constant 5 : index
    %29 = memref.load %arg1[%c5] : memref<7xf32, #tpu.memory_space<smem>>
    %c0_10 = arith.constant 0 : index
    %c0_11 = arith.constant 0 : index
    %30 = vector.load %arg7[%c0_10, %c0_11] : memref<128x128xbf16, #tpu.memory_space<vmem>>, vector<128x128xbf16>
    %31 = arith.extf %30 : vector<128x128xbf16> to vector<128x128xf32>
    %32 = vector.broadcast %29 : f32 to vector<128x128xf32>
    %33 = arith.mulf %32, %31 : vector<128x128xf32>
    %34 = arith.addf %28, %33 : vector<128x128xf32>
    %35 = arith.truncf %34 : vector<128x128xf32> to vector<128x128xbf16>
    %c0_12 = arith.constant 0 : index
    %c0_13 = arith.constant 0 : index
    %36 = vector.load %arg8[%c0_12, %c0_13] : memref<128x128xbf16, #tpu.memory_space<vmem>>, vector<128x128xbf16>
    %cst = arith.constant dense<0.000000e+00> : vector<128x128xf32>
    %37 = tpu.matmul %35, %36, %cst {dimension_numbers = #tpu.dot_dimension_numbers<[1], [0], [0], [1], [0, 0, 1, 1], [], []>} : vector<128x128xbf16>, vector<128x128xbf16>, vector<128x128xf32> -> vector<128x128xf32>
    %c0_14 = arith.constant 0 : index
    %c0_15 = arith.constant 0 : index
    %38 = vector.load %arg9[%c0_14, %c0_15] : memref<1x128xf32, #tpu.memory_space<vmem>>, vector<1x128xf32>
    %39 = vector.broadcast %38 : vector<1x128xf32> to vector<128x128xf32>
    %40 = arith.addf %37, %39 : vector<128x128xf32>
    %cst_16 = arith.constant 0.000000e+00 : f32
    %41 = vector.broadcast %cst_16 : f32 to vector<128x128xf32>
    %42 = arith.maximumf %40, %41 : vector<128x128xf32>
    %43 = arith.truncf %42 : vector<128x128xf32> to vector<128x128xbf16>
    %c0_17 = arith.constant 0 : index
    %c0_18 = arith.constant 0 : index
    %44 = vector.load %arg10[%c0_17, %c0_18] : memref<128x128xbf16, #tpu.memory_space<vmem>>, vector<128x128xbf16>
    tpu.vector_store %arg10[%c0_17, %c0_18], %43 {strides = array<i32>} : memref<128x128xbf16, #tpu.memory_space<vmem>>, vector<128x128xbf16>,
    %c6 = arith.constant 6 : index
    %45 = memref.load %arg1[%c6] : memref<7xf32, #tpu.memory_space<smem>>
    %cst_19 = arith.constant dense<0.000000e+00> : vector<128xf32>
    %46 = vector.multi_reduction <add>, %42, %cst_19 [0] : vector<128x128xf32> to vector<128xf32>
    %47 = vector.shape_cast %46 : vector<128xf32> to vector<1x128xf32>
    %48 = vector.broadcast %45 : f32 to vector<1x128xf32>
    %49 = arith.mulf %47, %48 : vector<1x128xf32>
    %50 = arith.mulf %42, %42 : vector<128x128xf32>
    %cst_20 = arith.constant dense<0.000000e+00> : vector<128xf32>
    %51 = vector.multi_reduction <add>, %50, %cst_20 [0] : vector<128x128xf32> to vector<128xf32>
    %52 = vector.shape_cast %51 : vector<128xf32> to vector<1x128xf32>
    %53 = vector.broadcast %45 : f32 to vector<1x128xf32>
    %54 = arith.mulf %52, %53 : vector<1x128xf32>
    %55 = tpu.concatenate %49, %54 in 0 : vector<1x128xf32>, vector<1x128xf32> -> vector<2x128xf32>
    %56 = vector.shape_cast %55 : vector<2x128xf32> to vector<1x2x128xf32>
    %c0_21 = arith.constant 0 : index
    %c0_22 = arith.constant 0 : index
    %c0_23 = arith.constant 0 : index
    %57 = vector.load %arg11[%c0_21, %c0_22, %c0_23] : memref<1x2x128xf32, #tpu.memory_space<vmem>>, vector<1x2x128xf32>
    tpu.vector_store %arg11[%c0_21, %c0_22, %c0_23], %56 {strides = array<i32>} : memref<1x2x128xf32, #tpu.memory_space<vmem>>, vector<1x2x128xf32>,
    return
  }
  func.func @transform_0(%arg0: i32) -> i32 {
    %c0_i32 = arith.constant 0 : i32
    %c0_i32_0 = arith.constant 0 : i32
    return %c0_i32 : i32
  }
  func.func @transform_1(%arg0: i32) -> (i32, i32) {
    %c0_i32 = arith.constant 0 : i32
    %c0_i32_0 = arith.constant 0 : i32
    return %arg0, %c0_i32 : i32, i32
  }
  func.func @transform_2(%arg0: i32) -> (i32, i32) {
    %c0_i32 = arith.constant 0 : i32
    %c0_i32_0 = arith.constant 0 : i32
    return %arg0, %c0_i32 : i32, i32
  }
  func.func @transform_3(%arg0: i32) -> (i32, i32) {
    %c0_i32 = arith.constant 0 : i32
    %c0_i32_0 = arith.constant 0 : i32
    return %arg0, %c0_i32 : i32, i32
  }
  func.func @transform_4(%arg0: i32) -> (i32, i32) {
    %c0_i32 = arith.constant 0 : i32
    %c0_i32_0 = arith.constant 0 : i32
    return %arg0, %c0_i32 : i32, i32
  }
  func.func @transform_5(%arg0: i32) -> (i32, i32) {
    %c0_i32 = arith.constant 0 : i32
    %c0_i32_0 = arith.constant 0 : i32
    return %arg0, %c0_i32 : i32, i32
  }
  func.func @transform_6(%arg0: i32) -> (i32, i32) {
    %c0_i32 = arith.constant 0 : i32
    %c0_i32_0 = arith.constant 0 : i32
    return %arg0, %c0_i32 : i32, i32
  }
  func.func @transform_7(%arg0: i32) -> (i32, i32) {
    %c0_i32 = arith.constant 0 : i32
    %c0_i32_0 = arith.constant 0 : i32
    %c0_i32_1 = arith.constant 0 : i32
    return %c0_i32, %c0_i32_0 : i32, i32
  }
  func.func @transform_8(%arg0: i32) -> (i32, i32) {
    %c0_i32 = arith.constant 0 : i32
    %c0_i32_0 = arith.constant 0 : i32
    %c0_i32_1 = arith.constant 0 : i32
    return %c0_i32, %c0_i32_0 : i32, i32
  }
  func.func @transform_9(%arg0: i32) -> (i32, i32) {
    %c0_i32 = arith.constant 0 : i32
    %c0_i32_0 = arith.constant 0 : i32
    return %arg0, %c0_i32 : i32, i32
  }
  func.func @transform_10(%arg0: i32) -> (i32, i32, i32) {
    %c0_i32 = arith.constant 0 : i32
    %c0_i32_0 = arith.constant 0 : i32
    %c0_i32_1 = arith.constant 0 : i32
    return %arg0, %c0_i32, %c0_i32_0 : i32, i32, i32
  }
}

module attributes {stable_mosaic.version = 11 : i64} {
  func.func @_bn_softmax_kernel(%arg0: i32, %arg1: memref<128x128xbf16, #tpu.memory_space<vmem>>, %arg2: memref<2x2x128xf32, #tpu.memory_space<vmem>>, %arg3: memref<8x128xf32, #tpu.memory_space<vmem>>, %arg4: memref<128x128xbf16, #tpu.memory_space<vmem>>, %arg5: memref<128x128xf32, #tpu.memory_space<vmem>>, %arg6: memref<128x128xf32, #tpu.memory_space<vmem>>) attributes {dimension_semantics = [#tpu.dimension_semantics<parallel>], iteration_bounds = array<i64: 2>, scalar_prefetch = 0 : i64, scratch_operands = 0 : i64, tpu.core_type = #tpu.core_type<tc>, window_params = [{transform_indices = @transform_0, window_bounds = array<i64: 128, 128>}, {pipeline_mode = #tpu.pipeline_mode<synchronous>, transform_indices = @transform_1, window_bounds = array<i64: 2, 2, 128>}, {pipeline_mode = #tpu.pipeline_mode<synchronous>, transform_indices = @transform_2, window_bounds = array<i64: 8, 128>}, {pipeline_mode = #tpu.pipeline_mode<synchronous>, transform_indices = @transform_3, window_bounds = array<i64: 128, 128>}, {transform_indices = @transform_4, window_bounds = array<i64: 128, 128>}, {transform_indices = @transform_5, window_bounds = array<i64: 128, 128>}]} {
    %c0 = arith.constant 0 : index
    %c0_0 = arith.constant 0 : index
    %c0_1 = arith.constant 0 : index
    %0 = vector.load %arg2[%c0, %c0_0, %c0_1] : memref<2x2x128xf32, #tpu.memory_space<vmem>>, vector<2x2x128xf32>
    %cst = arith.constant dense<0.000000e+00> : vector<2x128xf32>
    %1 = vector.multi_reduction <add>, %0, %cst [0] : vector<2x2x128xf32> to vector<2x128xf32>
    %2 = vector.extract_strided_slice %1 {offsets = [0, 0], sizes = [1, 128], strides = [1, 1]} : vector<2x128xf32> to vector<1x128xf32>
    %3 = vector.extract_strided_slice %1 {offsets = [1, 0], sizes = [1, 128], strides = [1, 1]} : vector<2x128xf32> to vector<1x128xf32>
    %4 = arith.mulf %2, %2 : vector<1x128xf32>
    %5 = arith.subf %3, %4 : vector<1x128xf32>
    %cst_2 = arith.constant 0.000000e+00 : f32
    %6 = vector.broadcast %cst_2 : f32 to vector<1x128xf32>
    %7 = arith.maximumf %5, %6 : vector<1x128xf32>
    %c0_3 = arith.constant 0 : index
    %c0_4 = arith.constant 0 : index
    %8 = vector.load %arg3[%c0_3, %c0_4] : memref<8x128xf32, #tpu.memory_space<vmem>>, vector<1x128xf32>
    %c1 = arith.constant 1 : index
    %c0_5 = arith.constant 0 : index
    %9 = vector.load %arg3[%c1, %c0_5] : memref<8x128xf32, #tpu.memory_space<vmem>>, vector<1x128xf32>
    %c2 = arith.constant 2 : index
    %c0_6 = arith.constant 0 : index
    %10 = vector.load %arg3[%c2, %c0_6] : memref<8x128xf32, #tpu.memory_space<vmem>>, vector<1x128xf32>
    %cst_7 = arith.constant 9.99999974E-6 : f32
    %11 = vector.broadcast %cst_7 : f32 to vector<1x128xf32>
    %12 = arith.addf %7, %11 : vector<1x128xf32>
    %13 = math.rsqrt %12 : vector<1x128xf32>
    %14 = arith.mulf %13, %8 : vector<1x128xf32>
    %15 = arith.mulf %2, %14 : vector<1x128xf32>
    %16 = arith.subf %9, %15 : vector<1x128xf32>
    %c0_8 = arith.constant 0 : index
    %c0_9 = arith.constant 0 : index
    %17 = vector.load %arg1[%c0_8, %c0_9] : memref<128x128xbf16, #tpu.memory_space<vmem>>, vector<128x128xbf16>
    %18 = arith.extf %17 : vector<128x128xbf16> to vector<128x128xf32>
    %19 = vector.broadcast %14 : vector<1x128xf32> to vector<128x128xf32>
    %20 = arith.mulf %18, %19 : vector<128x128xf32>
    %21 = vector.broadcast %16 : vector<1x128xf32> to vector<128x128xf32>
    %22 = arith.addf %20, %21 : vector<128x128xf32>
    %c0_10 = arith.constant 0 : index
    %c0_11 = arith.constant 0 : index
    %23 = vector.load %arg6[%c0_10, %c0_11] : memref<128x128xf32, #tpu.memory_space<vmem>>, vector<128x128xf32>
    tpu.vector_store %arg6[%c0_10, %c0_11], %22 {strides = array<i32>} : memref<128x128xf32, #tpu.memory_space<vmem>>, vector<128x128xf32>,
    %24 = arith.truncf %22 : vector<128x128xf32> to vector<128x128xbf16>
    %c0_12 = arith.constant 0 : index
    %c0_13 = arith.constant 0 : index
    %25 = vector.load %arg4[%c0_12, %c0_13] : memref<128x128xbf16, #tpu.memory_space<vmem>>, vector<128x128xbf16>
    %cst_14 = arith.constant dense<0.000000e+00> : vector<128x128xf32>
    %26 = tpu.matmul %24, %25, %cst_14 {dimension_numbers = #tpu.dot_dimension_numbers<[1], [0], [0], [1], [0, 0, 1, 1], [], []>} : vector<128x128xbf16>, vector<128x128xbf16>, vector<128x128xf32> -> vector<128x128xf32>
    %27 = vector.broadcast %10 : vector<1x128xf32> to vector<128x128xf32>
    %28 = arith.addf %26, %27 : vector<128x128xf32>
    %cst_15 = arith.constant dense<0xFF800000> : vector<128xf32>
    %29 = vector.multi_reduction <maximumf>, %28, %cst_15 [1] : vector<128x128xf32> to vector<128xf32>
    %30 = vector.shape_cast %29 : vector<128xf32> to vector<128x1xf32>
    %31 = vector.broadcast %30 : vector<128x1xf32> to vector<128x128xf32>
    %32 = arith.subf %28, %31 : vector<128x128xf32>
    %33 = math.exp %32 : vector<128x128xf32>
    %cst_16 = arith.constant dense<0.000000e+00> : vector<128xf32>
    %34 = vector.multi_reduction <add>, %33, %cst_16 [1] : vector<128x128xf32> to vector<128xf32>
    %35 = vector.shape_cast %34 : vector<128xf32> to vector<128x1xf32>
    %36 = tpu.reciprocal %35 {approx = true} : vector<128x1xf32> -> vector<128x1xf32>
    %37 = vector.broadcast %36 : vector<128x1xf32> to vector<128x128xf32>
    %38 = arith.mulf %33, %37 : vector<128x128xf32>
    %c0_17 = arith.constant 0 : index
    %c0_18 = arith.constant 0 : index
    %39 = vector.load %arg5[%c0_17, %c0_18] : memref<128x128xf32, #tpu.memory_space<vmem>>, vector<128x128xf32>
    tpu.vector_store %arg5[%c0_17, %c0_18], %38 {strides = array<i32>} : memref<128x128xf32, #tpu.memory_space<vmem>>, vector<128x128xf32>,
    return
  }
  func.func @transform_0(%arg0: i32) -> (i32, i32) {
    %c0_i32 = arith.constant 0 : i32
    %c0_i32_0 = arith.constant 0 : i32
    return %arg0, %c0_i32 : i32, i32
  }
  func.func @transform_1(%arg0: i32) -> (i32, i32, i32) {
    %c0_i32 = arith.constant 0 : i32
    %c0_i32_0 = arith.constant 0 : i32
    %c0_i32_1 = arith.constant 0 : i32
    %c0_i32_2 = arith.constant 0 : i32
    return %c0_i32, %c0_i32_0, %c0_i32_1 : i32, i32, i32
  }
  func.func @transform_2(%arg0: i32) -> (i32, i32) {
    %c0_i32 = arith.constant 0 : i32
    %c0_i32_0 = arith.constant 0 : i32
    %c0_i32_1 = arith.constant 0 : i32
    return %c0_i32, %c0_i32_0 : i32, i32
  }
  func.func @transform_3(%arg0: i32) -> (i32, i32) {
    %c0_i32 = arith.constant 0 : i32
    %c0_i32_0 = arith.constant 0 : i32
    %c0_i32_1 = arith.constant 0 : i32
    return %c0_i32, %c0_i32_0 : i32, i32
  }
  func.func @transform_4(%arg0: i32) -> (i32, i32) {
    %c0_i32 = arith.constant 0 : i32
    %c0_i32_0 = arith.constant 0 : i32
    return %arg0, %c0_i32 : i32, i32
  }
  func.func @transform_5(%arg0: i32) -> (i32, i32) {
    %c0_i32 = arith.constant 0 : i32
    %c0_i32_0 = arith.constant 0 : i32
    return %arg0, %c0_i32 : i32, i32
  }
}

</mosaic_0001>

<bundles_post_ra>
// kernel: dsmvc_forward.3
= control target key start
LH: loop header
LB: loop body
LE: loop exit
PB: predicated region body
PF: predicated region fallthrough
CT: control target
= control target key end

     0   :  { %s1025_s18 = smov 0   ;;  %s1220_s0 = inlined_call_operand.vmem [shape: bf16[256,128], index: 0, kind: input, shape index: {}]   ;;  %s1221_s1 = inlined_call_operand.vmem [shape: f32[2,2,128], index: 1, kind: input, shape index: {}]   ;;  %s1222_s2 = inlined_call_operand.vmem [shape: f32[8,128], index: 2, kind: input, shape index: {}]   ;;  %s1223_s3 = inlined_call_operand.vmem [shape: bf16[128,128], index: 3, kind: input, shape index: {}]   ;;  %s1224_s4 = inlined_call_operand.vmem [shape: f32[256,128], index: 4, kind: output, shape index: {0}]   ;;  %s1225_s5 = inlined_call_operand.vmem [shape: f32[256,128], index: 5, kind: output, shape index: {1}]  }
   0x1 LB: > { %s780_s19 = sadd.s32 4294967295, %s993_s18   ;;  %p784_p0 = scmp.ge.s32.totalorder %s993_s18, 1  ;;  %s993_s18 = sphi %s1025_s18, %s16_s18  }
   0x2   : > { %p191_p1 = scmp.lt.s32.totalorder %s993_s18, 3 }
   0x4   : > { %p192_p2 = pnand %p784_p0, %p191_p1 }
   0x5   : > { %v913_v0 = vld [vmem:[%s1223_s3] sm:$0xff] (!%p192_p2)   ;;  %v914_v1 = vld [vmem:[%s1223_s3 + $0x8] sm:$0xff] (!%p192_p2)   ;;  %v915_v2 = vld [vmem:[%s1223_s3 + $0x10] sm:$0xff] (!%p192_p2)   ;;  %vm245_vm0 = vcmask (!%p192_p2), 1041408   ;;  %s785_s9 = sshll.u32 (!%p192_p2), %s780_s19, 4  ;;  %v301_v17 = vlaneseq (!%p192_p2) }
   0x6   : > { %195 = sbr.rel (%p192_p2) target bundleno = 606 (0x25e), region = 36  ;;  %857 = vmatprep.subr.bf16.mxu0 (!%p192_p2), %v913_v0  ;;  %889 = vmatprep.subr.bf16.mxu1 (!%p192_p2), %v913_v0  ;;  %v916_v3 = vld [vmem:[%s1223_s3 + $0x18] sm:$0xff] (!%p192_p2)   ;;  %v243_v4 = vld [vmem:[%s1221_s1] sm:$0x3] (!%p192_p2)  ;;  %v244_v5 = vld [vmem:[%s1221_s1 + $0x2] sm:$0x3] (!%p192_p2) }
   0x7   : > { %858 = vmatpush3.bf16.msra.mxu0 (!%p192_p2), %v913_v0  ;;  %897 = vmatpush3.bf16.msra.mxu1 (!%p192_p2), %v913_v0  ;;  %v246_v6 = vsel (!%p192_p2), %vm245_vm0, %v243_v4, 0.0  ;;  %v247_v7 = vsel (!%p192_p2), %vm245_vm0, %v244_v5, 0.0  ;;  %v917_v9 = vld [vmem:[%s1223_s3 + $0x20] sm:$0xff] (!%p192_p2)   ;;  %v918_v12 = vld [vmem:[%s1223_s3 + $0x28] sm:$0xff] (!%p192_p2)   ;;  %p225_p3 = scmp.lt.s32.totalorder (!%p192_p2), %s785_s9, 31  ;;  %v919_v15 = vld [vmem:[%s1223_s3 + $0x30] sm:$0xff] (!%p192_p2)  }
   0x8   : > { %859 = vmatprep.subr.bf16.mxu0 (!%p192_p2), %v914_v1  ;;  %890 = vmatprep.subr.bf16.mxu1 (!%p192_p2), %v914_v1  ;;  %v1051_v8 = vadd.f32 (!%p192_p2), %v247_v7, %v246_v6  ;;  %v920_v18 = vld [vmem:[%s1223_s3 + $0x38] sm:$0xff] (!%p192_p2)   ;;  %v255_v19 = vld [vmem:[%s1222_s2] sm:$0x1] (!%p192_p2)  ;;  %v302_v20 = vshrl.u32 (!%p192_p2), %v301_v17, 7  ;;  %v256_v43 = vld [vmem:[%s1222_s2 + $0x1] sm:$0x1] (!%p192_p2) }
   0x9   : > { %v261_v21 = vrot.slane (!%p192_p2), %v255_v19, 7 }
   0xa   : > { %v249_v10 = vmul.f32 (!%p192_p2), %v1051_v8, %v1051_v8  ;;  %v303_v23 = vsub.s32 (!%p192_p2), 1, %v302_v20  ;;  %v323_v33 = vsub.s32 (!%p192_p2), 0, %v302_v20 }
   0xb   : > { %860 = vmatpush3.bf16.msra.mxu0 (!%p192_p2), %v914_v1  ;;  %898 = vmatpush3.bf16.msra.mxu1 (!%p192_p2), %v914_v1 }
   0xc   : > { %861 = vmatprep.subr.bf16.mxu0 (!%p192_p2), %v915_v2  ;;  %891 = vmatprep.subr.bf16.mxu1 (!%p192_p2), %v915_v2  ;;  %v251_v11 = vrot.slane (!%p192_p2), %v249_v10, 7 }
   0xd   : > { %s1227_s9 = smov (!%p225_p3, %s785_s9), 31 }
   0xe   : > { %v253_v13 = vsub.f32 %v1051_v8, %v251_v11  ;;  %s786_s16 = sshll.u32 %s1227_s9, 2  ;;  %s788_s25 = sshll.u32 %s1227_s9, 3 }
   0xf   : > { %862 = vmatpush3.bf16.msra.mxu0 %v915_v2  ;;  %899 = vmatpush3.bf16.msra.mxu1 %v915_v2  ;;  %s228_s22 = scalar_lea.vmem %s1220_s0, %s786_s16  ;;  %s1089_s28 = scalar_lea.vmem %s1225_s5, %s788_s25 }
  0x10   : > { %863 = vmatprep.subr.bf16.mxu0 %v916_v3  ;;  %892 = vmatprep.subr.bf16.mxu1 %v916_v3  ;;  %v254_v14 = vmax.f32 %v253_v13, 0.0  ;;  %v803_v22 = vld [vmem:[%s228_s22] sm:$0xff]   ;;  %v834_v25 = vld [vmem:[%s228_s22 + $0x8] sm:$0xff]   ;;  %v835_v31 = vld [vmem:[%s228_s22 + $0x10] sm:$0xff]   ;;  %s1183_s8 = scalar_lea.vmem %s1224_s4, %s788_s25 }
  0x11   : > { %v837_v24 = vld [vmem:[%s228_s22 + $0x20] sm:$0xff]   ;;  %v838_v27 = vld [vmem:[%s228_s22 + $0x28] sm:$0xff]   ;;  %v804_v29 = vunpack.c.l.bf16 %v803_v22  ;;  %v805_v30 = vunpack.c.h.bf16 %v803_v22  ;;  %v836_v32 = vld [vmem:[%s228_s22 + $0x18] sm:$0xff]   ;;  %v808_v36 = vunpack.c.l.bf16 %v834_v25  ;;  %v809_v40 = vunpack.c.h.bf16 %v834_v25 }
  0x12   : > { %v258_v16 = vadd.f32 1e-05, %v254_v14  ;;  %v820_v34 = vunpack.c.l.bf16 %v837_v24  ;;  %v821_v35 = vunpack.c.h.bf16 %v837_v24  ;;  %v839_v37 = vld [vmem:[%s228_s22 + $0x30] sm:$0xff]   ;;  %v824_v41 = vunpack.c.l.bf16 %v838_v27  ;;  %v840_v42 = vld [vmem:[%s228_s22 + $0x38] sm:$0xff]  }
  0x13   : > { %864 = vmatpush3.bf16.msra.mxu0 %v916_v3  ;;  %900 = vmatpush3.bf16.msra.mxu1 %v916_v3  ;;  %v825_v44 = vunpack.c.h.bf16 %v838_v27  ;;  %v812_v45 = vunpack.c.l.bf16 %v835_v31  ;;  %v813_v46 = vunpack.c.h.bf16 %v835_v31  ;;  %v816_v47 = vunpack.c.l.bf16 %v836_v32 }
  0x14   : > { %865 = vmatprep.subr.bf16.mxu0 %v917_v9  ;;  %893 = vmatprep.subr.bf16.mxu1 %v917_v9  ;;  %921 = vrsqrt.f32 %v258_v16  ;;  %v817_v49 = vunpack.c.h.bf16 %v836_v32  ;;  %v828_v50 = vunpack.c.l.bf16 %v839_v37  ;;  %v829_v51 = vunpack.c.h.bf16 %v839_v37  ;;  %v791_v32 = vld [vmem:[%s1222_s2 + $0x2] ss:$0 sm:$0xff] }
  0x15   : > { %v832_v54 = vunpack.c.l.bf16 %v840_v42  ;;  %v833_v55 = vunpack.c.h.bf16 %v840_v42 }
  0x17   : > { %866 = vmatpush3.bf16.msra.mxu0 %v917_v9  ;;  %901 = vmatpush3.bf16.msra.mxu1 %v917_v9 }
  0x18   : > { %867 = vmatprep.subr.bf16.mxu0 %v918_v12  ;;  %894 = vmatprep.subr.bf16.mxu1 %v918_v12 }
  0x1b   : > { %868 = vmatpush3.bf16.msra.mxu0 %v918_v12  ;;  %902 = vmatpush3.bf16.msra.mxu1 %v918_v12 }
  0x1c   : > { %869 = vmatprep.subr.bf16.mxu0 %v919_v15  ;;  %895 = vmatprep.subr.bf16.mxu1 %v919_v15 }
  0x1e   : > { %v922_v26 = vpop.eup %921 }
  0x1f   : > { %870 = vmatpush3.bf16.msra.mxu0 %v919_v15  ;;  %903 = vmatpush3.bf16.msra.mxu1 %v919_v15  ;;  %v263_v28 = vmul.f32 %v922_v26, %v261_v21 }
  0x20   : > { %871 = vmatprep.subr.bf16.mxu0 %v920_v18  ;;  %896 = vmatprep.subr.bf16.mxu1 %v920_v18 }
  0x21   : > { %v265_v38 = vrot.slane %v263_v28, 1  ;;  %v304_v39 = vrot.slane %v263_v28, %v303_v23 }
  0x23   : > { %872 = vmatpush3.bf16.msra.mxu0 %v920_v18  ;;  %904 = vmatpush3.bf16.msra.mxu1 %v920_v18  ;;  %v267_v48 = vmul.f32 %v265_v38, %v1051_v8  ;;  %v305_v52 = vmul.f32 %v804_v29, %v304_v39  ;;  %v306_v53 = vmul.f32 %v805_v30, %v304_v39 }
  0x24   : > { %v313_v57 = vmul.f32 %v820_v34, %v304_v39  ;;  %v314_v58 = vmul.f32 %v821_v35, %v304_v39  ;;  %v307_v59 = vmul.f32 %v808_v36, %v304_v39  ;;  %v308_v60 = vmul.f32 %v809_v40, %v304_v39 }
  0x25   : > { %v268_v56 = vsub.f32 %v256_v43, %v267_v48  ;;  %v315_v61 = vmul.f32 %v824_v41, %v304_v39  ;;  %v316_v62 = vmul.f32 %v825_v44, %v304_v39  ;;  %v309_v63 = vmul.f32 %v812_v45, %v304_v39 }
  0x26   : > { %v310_v1 = vmul.f32 %v813_v46, %v304_v39  ;;  %v311_v2 = vmul.f32 %v816_v47, %v304_v39  ;;  %v312_v3 = vmul.f32 %v817_v49, %v304_v39  ;;  %v317_v4 = vmul.f32 %v828_v50, %v304_v39 }
  0x27   : > { %v324_v0 = vrot.slane %v268_v56, %v323_v33  ;;  %v318_v5 = vmul.f32 %v829_v51, %v304_v39  ;;  %v319_v6 = vmul.f32 %v832_v54, %v304_v39  ;;  %v320_v7 = vmul.f32 %v833_v55, %v304_v39 }
  0x29   : > { %v325_v8 = vadd.f32 %v324_v0, %v305_v52  ;;  %v326_v9 = vadd.f32 %v324_v0, %v306_v53  ;;  %v333_v10 = vadd.f32 %v324_v0, %v313_v57  ;;  %v334_v11 = vadd.f32 %v324_v0, %v314_v58 }
  0x2a   : > { %v327_v12 = vadd.f32 %v324_v0, %v307_v59  ;;  %v328_v13 = vadd.f32 %v324_v0, %v308_v60  ;;  %v335_v14 = vadd.f32 %v324_v0, %v315_v61  ;;  %v336_v15 = vadd.f32 %v324_v0, %v316_v62 }
  0x2b   : > { %341 = vst [vmem:[%s1089_s28] sm:$0xff] %v325_v8  ;;  %342 = vst [vmem:[%s1089_s28 + $0x8] sm:$0xff] %v326_v9  ;;  %v357_v16 = vpack.c.bf16 %v326_v9, %v325_v8  ;;  %v361_v17 = vpack.c.bf16 %v334_v11, %v333_v10  ;;  %v329_v18 = vadd.f32 %v324_v0, %v309_v63 }
  0x2c   : > { %349 = vst [vmem:[%s1089_s28 + $0x40] sm:$0xff] %v333_v10  ;;  %350 = vst [vmem:[%s1089_s28 + $0x48] sm:$0xff] %v334_v11  ;;  %v330_v19 = vadd.f32 %v324_v0, %v310_v1  ;;  %v358_v20 = vpack.c.bf16 %v328_v13, %v327_v12  ;;  %v362_v21 = vpack.c.bf16 %v336_v15, %v335_v14 }
  0x2d   : > { %343 = vst [vmem:[%s1089_s28 + $0x10] sm:$0xff] %v327_v12  ;;  %344 = vst [vmem:[%s1089_s28 + $0x18] sm:$0xff] %v328_v13  ;;  %v331_v22 = vadd.f32 %v324_v0, %v311_v2  ;;  %v332_v23 = vadd.f32 %v324_v0, %v312_v3  ;;  %873 = vmatprep.mubr.bf16.mxu0 %v357_v16  ;;  %881 = vmatprep.mubr.bf16.mxu1 %v361_v17 }
  0x2e   : > { %351 = vst [vmem:[%s1089_s28 + $0x50] sm:$0xff] %v335_v14  ;;  %352 = vst [vmem:[%s1089_s28 + $0x58] sm:$0xff] %v336_v15  ;;  %v359_v24 = vpack.c.bf16 %v330_v19, %v329_v18  ;;  %v337_v25 = vadd.f32 %v324_v0, %v317_v4  ;;  %v338_v26 = vadd.f32 %v324_v0, %v318_v5  ;;  %874 = vmatmul.mubr.bf16.vlgmr.msra.gmra.mrb[0].mxu0 %v358_v20 }
  0x2f   : > { %345 = vst [vmem:[%s1089_s28 + $0x20] sm:$0xff] %v329_v18  ;;  %346 = vst [vmem:[%s1089_s28 + $0x28] sm:$0xff] %v330_v19  ;;  %882 = vmatmul.mubr.bf16.vlgmr.msra.gmra.mrb[0].mxu1 %v362_v21  ;;  %v339_v27 = vadd.f32 %v324_v0, %v319_v6  ;;  %v340_v28 = vadd.f32 %v324_v0, %v320_v7  ;;  %v360_v30 = vpack.c.bf16 %v332_v23, %v331_v22 }
  0x30   : > { %347 = vst [vmem:[%s1089_s28 + $0x30] sm:$0xff] %v331_v22  ;;  %348 = vst [vmem:[%s1089_s28 + $0x38] sm:$0xff] %v332_v23  ;;  %877 = vmatprep.mubr.bf16.mxu0 %v359_v24  ;;  %v363_v29 = vpack.c.bf16 %v338_v26, %v337_v25 }
  0x31   : > { %353 = vst [vmem:[%s1089_s28 + $0x60] sm:$0xff] %v337_v25  ;;  %354 = vst [vmem:[%s1089_s28 + $0x68] sm:$0xff] %v338_v26  ;;  %v364_v31 = vpack.c.bf16 %v340_v28, %v339_v27 }
  0x32   : > { %355 = vst [vmem:[%s1089_s28 + $0x70] sm:$0xff] %v339_v27  ;;  %356 = vst [vmem:[%s1089_s28 + $0x78] sm:$0xff] %v340_v28  ;;  %885 = vmatprep.mubr.bf16.mxu1 %v363_v29 }
  0x36   : > { %878 = vmatmul.mubr.bf16.gmra.mrb[4].mxu0 %v360_v30 }
  0x37   : > { %886 = vmatmul.mubr.bf16.gmra.mrb[4].mxu1 %v364_v31 }
 0x101   : > { %v875_v33 = vpop.f32.mrb[0].mxu0 }
 0x102   : > { %v883_v34 = vpop.f32.mrb[0].mxu1  ;;  %v476_v35 = vadd.f32 %v875_v33, %v791_v32  ;;  %v467_v37 = vpop.f32.mrb[1].mxu0 }
 0x103   : > { %v508_v36 = vadd.f32 %v883_v34, %v791_v32  ;;  %v499_v38 = vpop.f32.mrb[1].mxu1  ;;  %v876_v39 = vpop.f32.mrb[2].mxu0  ;;  %v468_v43 = vadd.f32 %v791_v32, %v467_v37 }
 0x104   : > { %v884_v40 = vpop.f32.mrb[2].mxu1  ;;  %534 = vmax.xlane.f32.xlu1 %v476_v35  ;;  %v470_v42 = vpop.f32.mrb[3].mxu0  ;;  %v479_v44 = vadd.f32 %v876_v39, %v791_v32  ;;  %v500_v47 = vadd.f32 %v791_v32, %v499_v38 }
 0x105   : > { %550 = vmax.xlane.f32.xlu0 %v508_v36  ;;  %v502_v41 = vpop.f32.mrb[3].mxu1  ;;  %v511_v48 = vadd.f32 %v884_v40, %v791_v32  ;;  %v471_v56 = vadd.f32 %v791_v32, %v470_v42 }
 0x106   : > { %v503_v55 = vadd.f32 %v791_v32, %v502_v41 }
 0x108   : > { %536 = vmax.xlane.f32.xlu1 %v479_v44 }
 0x109   : > { %530 = vmax.xlane.f32.xlu0 %v468_v43  ;;  %v879_v45 = vpop.f32.mrb[4].mxu0 }
 0x10a   : > { %v887_v46 = vpop.f32.mrb[4].mxu1  ;;  %v483_v49 = vpop.f32.mrb[5].mxu0  ;;  %v492_v57 = vadd.f32 %v879_v45, %v791_v32 }
 0x10b   : > { %v515_v50 = vpop.f32.mrb[5].mxu1  ;;  %v880_v51 = vpop.f32.mrb[6].mxu0  ;;  %v484_v59 = vadd.f32 %v791_v32, %v483_v49  ;;  %v1119_v63 = vadd.f32 %v887_v46, %v791_v32 }
 0x10c   : > { %v888_v52 = vpop.f32.mrb[6].mxu1  ;;  %552 = vmax.xlane.f32.xlu1 %v511_v48  ;;  %v486_v53 = vpop.f32.mrb[7].mxu0  ;;  %v495_v58 = vadd.f32 %v880_v51, %v791_v32  ;;  %v1112_v61 = vadd.f32 %v791_v32, %v515_v50 }
 0x10d   : > { %546 = vmax.xlane.f32.xlu0 %v500_v47  ;;  %v518_v54 = vpop.f32.mrb[7].mxu1  ;;  %v1110_v60 = vadd.f32 %v791_v32, %v486_v53  ;;  %v1121_v0 = vadd.f32 %v888_v52, %v791_v32 }
 0x10e   : > { %v1115_v62 = vadd.f32 %v791_v32, %v518_v54 }
 0x110   : > { %548 = vmax.xlane.f32.xlu1 %v503_v55 }
 0x111   : > { %532 = vmax.xlane.f32.xlu0 %v471_v56 }
 0x114   : > { %544 = vmax.xlane.f32.xlu1 %v495_v58 }
 0x115   : > { %542 = vmax.xlane.f32.xlu0 %v492_v57 }
 0x118   : > { %540 = vmax.xlane.f32.xlu1 %v1110_v60 }
 0x119   : > { %538 = vmax.xlane.f32.xlu0 %v484_v59 }
 0x11c   : > { %556 = vmax.xlane.f32.xlu1 %v1115_v62 }
 0x11d   : > { %554 = vmax.xlane.f32.xlu0 %v1112_v61 }
 0x120   : > { %560 = vmax.xlane.f32.xlu1 %v1121_v0 }
 0x121   : > { %558 = vmax.xlane.f32.xlu0 %v1119_v63 }
 0x191   : > { %v535_v2 = vpop.xlane.xlu1 %534 }
 0x192   : > { %v551_v1 = vpop.xlane.xlu0 %550  ;;  %v564_v3 = vsub.f32 %v476_v35, %v535_v2 }
 0x193   : > { %v572_v4 = vsub.f32 %v508_v36, %v551_v1 }
 0x194   : > { %v582_v5 = vmul.f32 1.442695, %v564_v3 }
 0x195   : > { %v537_v6 = vpop.xlane.xlu1 %536  ;;  %v598_v9 = vmul.f32 1.442695, %v572_v4 }
 0x196   : > { %v531_v7 = vpop.xlane.xlu0 %530  ;;  %v565_v8 = vsub.f32 %v479_v44, %v537_v6  ;;  %923 = vpow2.f32 %v582_v5 }
 0x197   : > { %v562_v10 = vsub.f32 %v468_v43, %v531_v7 }
 0x198   : > { %v584_v11 = vmul.f32 1.442695, %v565_v8 }
 0x199   : > { %v553_v12 = vpop.xlane.xlu1 %552  ;;  %v578_v16 = vmul.f32 1.442695, %v562_v10 }
 0x19a   : > { %v547_v13 = vpop.xlane.xlu0 %546  ;;  %925 = vpow2.f32 %v584_v11  ;;  %v573_v14 = vsub.f32 %v511_v48, %v553_v12 }
 0x19b   : > { %v570_v15 = vsub.f32 %v500_v47, %v547_v13  ;;  %927 = vpow2.f32 %v598_v9 }
 0x19c   : > { %v600_v17 = vmul.f32 1.442695, %v573_v14 }
 0x19d   : > { %v549_v18 = vpop.xlane.xlu1 %548  ;;  %v594_v20 = vmul.f32 1.442695, %v570_v15 }
 0x19e   : > { %v533_v19 = vpop.xlane.xlu0 %532  ;;  %929 = vpow2.f32 %v600_v17  ;;  %v571_v21 = vsub.f32 %v503_v55, %v549_v18 }
 0x19f   : > { %v563_v22 = vsub.f32 %v471_v56, %v533_v19  ;;  %931 = vpow2.f32 %v578_v16 }
 0x1a0   : > { %v1125_v24 = vpop.eup %923  ;;  %933 = vpow2.f32 %v594_v20  ;;  %v596_v27 = vmul.f32 1.442695, %v571_v21 }
 0x1a1   : > { %v580_v23 = vmul.f32 1.442695, %v563_v22  ;;  %v545_v25 = vpop.xlane.xlu1 %544  ;;  %614 = vadd.xlane.f32.xlu0 %v1125_v24 }
 0x1a2   : > { %v543_v26 = vpop.xlane.xlu0 %542  ;;  %v569_v28 = vsub.f32 %v495_v58, %v545_v25 }
 0x1a3   : > { %v568_v29 = vsub.f32 %v492_v57, %v543_v26  ;;  %935 = vpow2.f32 %v580_v23 }
 0x1a4   : > { %v1128_v30 = vpop.eup %925  ;;  %937 = vpow2.f32 %v596_v27  ;;  %v592_v35 = vmul.f32 1.442695, %v569_v28 }
 0x1a5   : > { %v590_v31 = vmul.f32 1.442695, %v568_v29  ;;  %v1130_v32 = vpop.eup %927  ;;  %616 = vadd.xlane.f32.xlu1 %v1128_v30  ;;  %v541_v33 = vpop.xlane.xlu1 %540 }
 0x1a6   : > { %v539_v34 = vpop.xlane.xlu0 %538  ;;  %v567_v36 = vsub.f32 %v1110_v60, %v541_v33  ;;  %630 = vadd.xlane.f32.xlu0 %v1130_v32 }
 0x1a7   : > { %v566_v37 = vsub.f32 %v484_v59, %v539_v34  ;;  %939 = vpow2.f32 %v590_v31 }
 0x1a8   : > { %v1135_v38 = vpop.eup %929  ;;  %941 = vpow2.f32 %v592_v35  ;;  %v588_v43 = vmul.f32 1.442695, %v567_v36 }
 0x1a9   : > { %v586_v39 = vmul.f32 1.442695, %v566_v37  ;;  %v1137_v40 = vpop.eup %931  ;;  %632 = vadd.xlane.f32.xlu1 %v1135_v38  ;;  %v557_v41 = vpop.xlane.xlu1 %556 }
 0x1aa   : > { %v555_v42 = vpop.xlane.xlu0 %554  ;;  %v575_v44 = vsub.f32 %v1115_v62, %v557_v41  ;;  %610 = vadd.xlane.f32.xlu0 %v1137_v40  ;;  %v1143_v46 = vpop.eup %933 }
 0x1ab   : > { %v574_v45 = vsub.f32 %v1112_v61, %v555_v42  ;;  %943 = vpow2.f32 %v586_v39 }
 0x1ac   : > { %945 = vpow2.f32 %v588_v43  ;;  %v604_v51 = vmul.f32 1.442695, %v575_v44 }
 0x1ad   : > { %v602_v47 = vmul.f32 1.442695, %v574_v45  ;;  %v1145_v48 = vpop.eup %935  ;;  %v561_v49 = vpop.xlane.xlu1 %560 }
 0x1ae   : > { %v559_v50 = vpop.xlane.xlu0 %558  ;;  %626 = vadd.xlane.f32.xlu0 %v1143_v46  ;;  %612 = vadd.xlane.f32.xlu1 %v1145_v48  ;;  %v577_v53 = vsub.f32 %v1121_v0, %v561_v49  ;;  %v1151_v54 = vpop.eup %937 }
 0x1af   : > { %v576_v52 = vsub.f32 %v1119_v63, %v559_v50  ;;  %947 = vpow2.f32 %v602_v47 }
 0x1b0   : > { %949 = vpow2.f32 %v604_v51  ;;  %v608_v57 = vmul.f32 1.442695, %v577_v53 }
 0x1b1   : > { %v606_v55 = vmul.f32 1.442695, %v576_v52  ;;  %v1153_v56 = vpop.eup %939 }
 0x1b2   : > { %628 = vadd.xlane.f32.xlu1 %v1151_v54  ;;  %622 = vadd.xlane.f32.xlu0 %v1153_v56  ;;  %v1157_v58 = vpop.eup %941 }
 0x1b3   : > { %951 = vpow2.f32 %v606_v55 }
 0x1b4   : > { %953 = vpow2.f32 %v608_v57 }
 0x1b5   : > { %v1159_v59 = vpop.eup %943 }
 0x1b6   : > { %624 = vadd.xlane.f32.xlu1 %v1157_v58  ;;  %618 = vadd.xlane.f32.xlu0 %v1159_v59  ;;  %v1163_v60 = vpop.eup %945 }
 0x1b9   : > { %v1165_v61 = vpop.eup %947 }
 0x1ba   : > { %620 = vadd.xlane.f32.xlu1 %v1163_v60  ;;  %634 = vadd.xlane.f32.xlu0 %v1165_v61  ;;  %v1169_v62 = vpop.eup %949 }
 0x1bd   : > { %v1171_v63 = vpop.eup %951 }
 0x1be   : > { %636 = vadd.xlane.f32.xlu1 %v1169_v62  ;;  %638 = vadd.xlane.f32.xlu0 %v1171_v63  ;;  %v1175_v0 = vpop.eup %953 }
 0x1c2   : > { %640 = vadd.xlane.f32.xlu1 %v1175_v0 }
 0x22e   : > { %v615_v1 = vpop.xlane.xlu0 %614 }
 0x22f   : > { %955 = vrcp.f32 %v615_v1 }
 0x232   : > { %v617_v2 = vpop.xlane.xlu1 %616 }
 0x233   : > { %957 = vrcp.f32 %v617_v2  ;;  %v631_v3 = vpop.xlane.xlu0 %630 }
 0x234   : > { %959 = vrcp.f32 %v631_v3 }
 0x236   : > { %v633_v4 = vpop.xlane.xlu1 %632 }
 0x237   : > { %961 = vrcp.f32 %v633_v4  ;;  %v611_v5 = vpop.xlane.xlu0 %610 }
 0x238   : > { %963 = vrcp.f32 %v611_v5 }
 0x239   : > { %v956_v6 = vpop.eup %955 }
 0x23a   : > { %v660_v7 = vmul.f32 %v956_v6, %v1125_v24 }
 0x23b   : > { %v613_v8 = vpop.xlane.xlu1 %612  ;;  %v627_v9 = vpop.xlane.xlu0 %626 }
 0x23c   : > { %965 = vrcp.f32 %v613_v8  ;;  %676 = vst [vmem:[%s1183_s8 + $0x10] sm:$0xff] %v660_v7 }
 0x23d   : > { %v958_v10 = vpop.eup %957  ;;  %967 = vrcp.f32 %v627_v9 }
 0x23e   : > { %v960_v11 = vpop.eup %959  ;;  %v661_v12 = vmul.f32 %v958_v10, %v1128_v30 }
 0x23f   : > { %v668_v13 = vmul.f32 %v960_v11, %v1130_v32  ;;  %v629_v14 = vpop.xlane.xlu1 %628  ;;  %v623_v15 = vpop.xlane.xlu0 %622 }
 0x240   : > { %677 = vst [vmem:[%s1183_s8 + $0x18] sm:$0xff] %v661_v12  ;;  %969 = vrcp.f32 %v629_v14 }
 0x241   : > { %v962_v16 = vpop.eup %961  ;;  %684 = vst [vmem:[%s1183_s8 + $0x50] sm:$0xff] %v668_v13  ;;  %971 = vrcp.f32 %v623_v15 }
 0x242   : > { %v964_v17 = vpop.eup %963  ;;  %v669_v18 = vmul.f32 %v962_v16, %v1135_v38 }
 0x243   : > { %v658_v19 = vmul.f32 %v964_v17, %v1137_v40  ;;  %v625_v20 = vpop.xlane.xlu1 %624  ;;  %v619_v21 = vpop.xlane.xlu0 %618 }
 0x244   : > { %685 = vst [vmem:[%s1183_s8 + $0x58] sm:$0xff] %v669_v18  ;;  %973 = vrcp.f32 %v625_v20 }
 0x245   : > { %674 = vst [vmem:[%s1183_s8] sm:$0xff] %v658_v19  ;;  %975 = vrcp.f32 %v619_v21 }
 0x246   : > { %v966_v22 = vpop.eup %965 }
 0x247   : > { %v968_v23 = vpop.eup %967  ;;  %v659_v24 = vmul.f32 %v966_v22, %v1145_v48  ;;  %v621_v25 = vpop.xlane.xlu1 %620 }
 0x248   : > { %v635_v26 = vpop.xlane.xlu0 %634  ;;  %v666_v27 = vmul.f32 %v968_v23, %v1143_v46  ;;  %977 = vrcp.f32 %v621_v25 }
 0x249   : > { %675 = vst [vmem:[%s1183_s8 + $0x8] sm:$0xff] %v659_v24  ;;  %979 = vrcp.f32 %v635_v26 }
 0x24a   : > { %v970_v28 = vpop.eup %969  ;;  %682 = vst [vmem:[%s1183_s8 + $0x40] sm:$0xff] %v666_v27 }
 0x24b   : > { %v972_v29 = vpop.eup %971  ;;  %v667_v30 = vmul.f32 %v970_v28, %v1151_v54  ;;  %v637_v31 = vpop.xlane.xlu1 %636 }
 0x24c   : > { %v639_v32 = vpop.xlane.xlu0 %638  ;;  %v664_v33 = vmul.f32 %v972_v29, %v1153_v56  ;;  %981 = vrcp.f32 %v637_v31 }
 0x24d   : > { %683 = vst [vmem:[%s1183_s8 + $0x48] sm:$0xff] %v667_v30  ;;  %983 = vrcp.f32 %v639_v32 }
 0x24e   : > { %v974_v34 = vpop.eup %973  ;;  %680 = vst [vmem:[%s1183_s8 + $0x30] sm:$0xff] %v664_v33 }
 0x24f   : > { %v976_v35 = vpop.eup %975  ;;  %v665_v36 = vmul.f32 %v974_v34, %v1157_v58  ;;  %v641_v37 = vpop.xlane.xlu1 %640 }
 0x250   : > { %v662_v38 = vmul.f32 %v976_v35, %v1159_v59  ;;  %985 = vrcp.f32 %v641_v37 }
 0x251   : > { %681 = vst [vmem:[%s1183_s8 + $0x38] sm:$0xff] %v665_v36 }
 0x252   : > { %v978_v39 = vpop.eup %977  ;;  %678 = vst [vmem:[%s1183_s8 + $0x20] sm:$0xff] %v662_v38 }
 0x253   : > { %v980_v40 = vpop.eup %979  ;;  %v663_v41 = vmul.f32 %v978_v39, %v1163_v60 }
 0x254   : > { %v670_v42 = vmul.f32 %v980_v40, %v1165_v61 }
 0x255   : > { %679 = vst [vmem:[%s1183_s8 + $0x28] sm:$0xff] %v663_v41 }
 0x256   : > { %v982_v43 = vpop.eup %981  ;;  %686 = vst [vmem:[%s1183_s8 + $0x60] sm:$0xff] %v670_v42 }
 0x257   : > { %v984_v44 = vpop.eup %983  ;;  %v671_v45 = vmul.f32 %v982_v43, %v1169_v62 }
 0x258   : > { %v672_v46 = vmul.f32 %v984_v44, %v1171_v63 }
 0x259   : > { %687 = vst [vmem:[%s1183_s8 + $0x68] sm:$0xff] %v671_v45 }
 0x25a   : > { %v986_v47 = vpop.eup %985  ;;  %688 = vst [vmem:[%s1183_s8 + $0x70] sm:$0xff] %v672_v46 }
 0x25b   : > { %v673_v48 = vmul.f32 %v986_v47, %v1175_v0 }
 0x25d   : > { %689 = vst [vmem:[%s1183_s8 + $0x78] sm:$0xff] %v673_v48 }
 0x25e PF: > { %s16_s18 = sadd.s32 1, %s993_s18  }
 0x25f   : > { %p13_p4 = scmp.ge.s32.totalorder %s16_s18, 4  }
 0x261   :  { %15 = sbr.rel (!%p13_p4) target bundleno = 1 (0x1), region = 78 }

// kernel: dsmvc_forward.2
= control target key start
LH: loop header
LB: loop body
LE: loop exit
PB: predicated region body
PF: predicated region fallthrough
CT: control target
= control target key end

     0   :  { %s2552_s0 = inlined_call_operand.vmem [shape: f32[7], index: 0, kind: input, shape index: {}]   ;;  %s2553_s1 = inlined_call_operand.vmem [shape: bf16[256,128], index: 1, kind: input, shape index: {}]   ;;  %s2554_s2 = inlined_call_operand.vmem [shape: bf16[256,128], index: 2, kind: input, shape index: {}]   ;;  %s2555_s3 = inlined_call_operand.vmem [shape: bf16[256,128], index: 3, kind: input, shape index: {}]   ;;  %s2556_s4 = inlined_call_operand.vmem [shape: bf16[256,128], index: 4, kind: input, shape index: {}]   ;;  %s2557_s5 = inlined_call_operand.hbm [shape: bf16[256,128], index: 5, kind: input, shape index: {}]   ;;  %s2558_s6 = inlined_call_operand.hbm [shape: bf16[256,128], index: 6, kind: input, shape index: {}]   ;;  %s2559_s7 = inlined_call_operand.vmem [shape: bf16[128,128], index: 7, kind: input, shape index: {}]   ;;  %s2560_s8 = inlined_call_operand.vmem [shape: f32[1,128], index: 8, kind: input, shape index: {}]   ;;  %s2561_s9 = inlined_call_operand.vmem [shape: bf16[256,128], index: 9, kind: output, shape index: {0}]   ;;  %s2562_s10 = inlined_call_operand.vmem [shape: f32[2,2,128], index: 10, kind: output, shape index: {1}]  }
   0x1   :  { %2567 = sst [smem:[#allocation13_spill]] %s2552_s0 }
   0x2   :  { %2568 = sst [smem:[#allocation14_spill]] %s2557_s5 }
   0x3   :  { %16 = vsyncpa [#allocation4], 0 }
   0x4   :  { %17 = vsyncpa [#allocation3], 0 }
   0x5   :  { %19 = vsyncpa [#allocation3 + $0x1], 0 }
   0x6   :  { %20 = vsyncpa [#allocation7], 0 }
   0x7   :  { %22 = vsyncpa [#allocation7 + $0x1], 0  ;;  %s2101_s13 = smov 0   ;;  %s2103_s14 = smov 0  }
   0x8   :  { %s2105_s15 = smov 0   ;;  %s2107_s16 = smov 0  }
   0x9 LB: > { %2569 = sst [smem:[#allocation11_spill]] %s2035_s15  ;;  %s2120_s17 = sadd.s32 4294967295, %s2039_s16   ;;  %s2039_s16 = sphi %s2107_s16, %s2584_s16   ;;  %s2035_s15 = sphi %s2105_s15, %s2581_s15   ;;  %s2031_s14 = sphi %s2103_s14, %s2583_s14   ;;  %s2027_s13 = sphi %s2101_s13, %s2582_s13  }
   0xa   : > { %s2123_s18 = sadd.s32 1, %s2039_s16   ;;  %s160_s20 = sadd.s32 1, %s2035_s15 }
   0xb   : > { %s157_s19 = ssub.s32 %s2039_s16, %s2123_s18  ;;  %p167_p1 = scmp.ne.s32.totalorder %s2035_s15, %s2031_s14 }
   0xc   : > { %p158_p0 = scmp.eq.s32.totalorder %s157_s19, 0  ;;  %p168_p2 = scmp.eq.s32.totalorder %s2039_s16, 0 }
   0xd   : > { %p173_p3 = scmp.ne.s32.totalorder %s2031_s14, %s2027_s13  ;;  %p174_p5 = scmp.eq.s32.totalorder %s2120_s17, 0 }
   0xe   : > { %s2133_s21 = scalar_select %p158_p0, %s2035_s15, %s160_s20  }
   0xf   : > { %p169_p4 = por %p168_p2, %p167_p1  ;;  %p1437_p6 = scmp.ge.s32.totalorder %s2039_s16, 1 }
  0x10   : > { %2570 = sst [smem:[#allocation12_spill]] %s2133_s21  ;;  %p304_p7 = scmp.lt.s32.totalorder %s2039_s16, 3 }
  0x11   : > { %p2140_p8 = por %p174_p5, %p173_p3  ;;  %s2573_s0 = sld [smem:[#allocation13_spill]] }
  0x12   : > { %p2144_p9 = pnand %p1437_p6, %p304_p7  ;;  %p1877_p11 = scmp.lt.s32.totalorder %s2039_s16, 2 }
  0x13   : > { %s2571_s22 = scalar_select %p2140_p8, 1, 0 }
  0x14   : > { %s2572_s23 = scalar_select %p2144_p9, 1, 0 }
  0x15   : > { %p1865_p10 = pneg %p2144_p9  ;;  %s2155_s27 = sand.u32 1, %s2035_s15  }
  0x16   : > { %p2163_p13 = pnand %p1877_p11, %p169_p4  ;;  %s1440_s30 = sshll.u32 %s2155_s27, 6 }
  0x17   : > { %s317_s26 = sshll.u32 %s2573_s0, 4  ;;  %p2159_p12 = pnand %p1865_p10, %p174_p5  ;;  %s318_s26 = int_to_ptr.vmem [resolvable:$true] %s317_s26 }
  0x18   : > { %s1922_s11 = scalar_lea.vmem %s318_s26, 16  ;;  %p1930_p6 = scmp.lt.s32.totalorder %s318_s26, %s318_s26 }
  0x19   : > { %p1923_p0 = scmp.ne.s32.totalorder %s318_s26, %s1922_s11  ;;  %p1924_p1 = pneg %p2159_p12 }
  0x1a   : > { %p1931_p7 = scmp.lt.s32.totalorder %s1922_s11, %s1922_s11 }
  0x1b   : > { %p1925_p2 = pnand %p1924_p1, %p1923_p0 }
  0x1c   : > { %p1932_p8 = por %p1931_p7, %p1930_p6 }
  0x1d   : > { %p1926_p3 = pneg %p1925_p2 }
  0x1f   : > { %p1933_p9 = pnand %p1932_p8, %p1926_p3 }
  0x21   : > { %1936 = shalt.err (!%p1933_p9)
}
  0x22   : > { %s2041_s12 = smov [#allocation2]   ;;  %s2565_s13 = sshll.u32 %s2039_s16, 10 }
  0x23   : > { %1868 = dma.vmem_to_smem (!%p2159_p12), %s318_s26, 16, %s2041_s12, [#allocation4]  }
  0x24   : > { %s2576_s5 = sld [smem:[#allocation14_spill]]  ;;  %s374_s25 = scalar_lea.vmem [#allocation5], %s1440_s30 }
  0x25   : > { %s381_s28 = sshll.u32 %s374_s25, 4  ;;  %s371_s11 = scalar_lea.sflag [#allocation3], %s2155_s27  ;;  %s2182_s28 = int_to_ptr.vmem [resolvable:$true] %s381_s28 }
  0x26   : > { %p1939_p8 = pneg %p2163_p13 }
  0x2a   : > { %s2178_s24 = scalar_lea.hbm %s2576_s5, %s2565_s13  ;;  %s1942_s19 = scalar_lea.hbm %s2576_s5, 2048 }
  0x2b   : > { %s1937_s0 = scalar_lea.hbm %s2178_s24, 1024  ;;  %p1943_p11 = scmp.lt.u32.totalorder %s2178_s24, %s2576_s5 }
  0x2c   : > { %p1938_p4 = scmp.ne.s32.totalorder %s2178_s24, %s1937_s0  ;;  %p1944_p12 = scmp.lt.u32.totalorder %s1942_s19, %s1937_s0 }
  0x2d   : > { %p1946_p1 = scmp.lt.u32.totalorder %s1937_s0, %s2178_s24 }
  0x2e   : > { %p1940_p9 = pnand %p1939_p8, %p1938_p4  ;;  %p1945_p0 = por %p1944_p12, %p1943_p11 }
  0x30   : > { %p1941_p10 = pneg %p1940_p9  ;;  %p1947_p2 = por %p1946_p1, %p1945_p0 }
  0x32   : > { %p1948_p3 = pnand %p1947_p2, %p1941_p10 }
  0x34   : > { %1951 = shalt.err (!%p1948_p3)
}
  0x35   : > { %s1952_s25 = scalar_lea.vmem %s2182_s28, 1024  ;;  %s2042_s26 = smov [#allocation5]  }
  0x36   : > { %p1953_p6 = scmp.ne.s32.totalorder %s2182_s28, %s1952_s25  ;;  %s1957_s12 = sshll.u32 %s2042_s26, 4  ;;  %s1958_s12 = int_to_ptr.vmem [resolvable:$false] %s1957_s12 }
  0x37   : > { %s1959_s13 = scalar_lea.vmem %s1958_s12, 2048  ;;  %p1960_p9 = scmp.lt.s32.totalorder %s2182_s28, %s1958_s12 }
  0x38   : > { %p1955_p7 = pnand %p1953_p6, %p1939_p8  ;;  %p1961_p11 = scmp.lt.s32.totalorder %s1959_s13, %s1952_s25 }
  0x3a   : > { %p1956_p4 = pneg %p1955_p7  ;;  %p1962_p12 = por %p1961_p11, %p1960_p9 }
  0x3c   : > { %p1963_p0 = pnand %p1962_p12, %p1956_p4 }
  0x3e   : > { %1966 = shalt.err (!%p1963_p0)
}
  0x3f   : > { %s2043_s0 = smov 64   ;;  %s2044_s19 = smov 4  }
  0x40   : > { %1872 = dma.hbm_to_vmem [thread:$0]  (!%p2163_p13), %s2178_s24, 1024, %s2182_s28, %s371_s11, %s2043_s0, %s2043_s0, %s2044_s19  }
  0x41   : > { %s2577_s20 = sshll.u32 %s2039_s16, 10  ;;  %s395_s13 = scalar_lea.vmem [#allocation6], %s1440_s30 }
  0x42   : > { %s2220_s12 = scalar_lea.hbm %s2558_s6, %s2577_s20  ;;  %s402_s5 = sshll.u32 %s395_s13, 4  ;;  %s2224_s5 = int_to_ptr.vmem [resolvable:$true] %s402_s5 }
  0x43   : > { %s392_s21 = scalar_lea.sflag [#allocation7], %s2155_s27  ;;  %s1967_s15 = scalar_lea.hbm %s2220_s12, 1024 }
  0x44   : > { %p1968_p10 = scmp.ne.s32.totalorder %s2220_s12, %s1967_s15  ;;  %s1972_s28 = scalar_lea.hbm %s2558_s6, 2048 }
  0x45   : > { %p1973_p3 = scmp.lt.u32.totalorder %s2220_s12, %s2558_s6  ;;  %p1974_p6 = scmp.lt.u32.totalorder %s1972_s28, %s1967_s15 }
  0x46   : > { %p1970_p1 = pnand %p1968_p10, %p1939_p8  ;;  %p1976_p4 = scmp.lt.u32.totalorder %s1967_s15, %s2220_s12 }
  0x47   : > { %p1975_p7 = por %p1974_p6, %p1973_p3 }
  0x48   : > { %p1971_p2 = pneg %p1970_p1 }
  0x49   : > { %p1977_p9 = por %p1976_p4, %p1975_p7 }
  0x4b   : > { %p1978_p11 = pnand %p1977_p9, %p1971_p2 }
  0x4d   : > { %1981 = shalt.err (!%p1978_p11)
}
  0x4e   : > { %s1982_s30 = scalar_lea.vmem %s2224_s5, 1024  ;;  %s2045_s25 = smov [#allocation6]  }
  0x4f   : > { %p1983_p12 = scmp.ne.s32.totalorder %s2224_s5, %s1982_s30  ;;  %s1987_s26 = sshll.u32 %s2045_s25, 4  ;;  %s1988_s26 = int_to_ptr.vmem [resolvable:$false] %s1987_s26 }
  0x50   : > { %s1989_s13 = scalar_lea.vmem %s1988_s26, 2048  ;;  %p1990_p1 = scmp.lt.s32.totalorder %s2224_s5, %s1988_s26 }
  0x51   : > { %p1985_p0 = pnand %p1983_p12, %p1939_p8  ;;  %p1991_p3 = scmp.lt.s32.totalorder %s1989_s13, %s1982_s30 }
  0x53   : > { %p1986_p10 = pneg %p1985_p0  ;;  %p1992_p6 = por %p1991_p3, %p1990_p1 }
  0x55   : > { %p1993_p7 = pnand %p1992_p6, %p1986_p10 }
  0x57   : > { %1996 = shalt.err (!%p1993_p7)
}
  0x58   : > { %1875 = dma.hbm_to_vmem [thread:$0]  (!%p2163_p13), %s2220_s12, 1024, %s2224_s5, %s392_s21, %s2043_s0, %s2043_s0, %s2044_s19  }
  0x59   : > { %p2578_p8 = scmp.ne.s32.totalorder %s2572_s23, 0 }
  0x5b   : > { %414 = sbr.rel (%p2578_p8) target bundleno = 433 (0x1b1), region = 56 }
  0x62   : > { %2014 = dma.done.wait (%p174_p5), [#allocation4], 16  }
  0x63   : > { %2016 = vsyncadd (%p174_p5), [#allocation4], 4294967280  ;;  %s420_s15 = sand.u32 1, %s2031_s14   ;;  %p2579_p2 = scmp.ne.s32.totalorder %s2571_s22, 0 }
  0x64   : > { %s1448_s29 = sshll.u32 %s420_s15, 6  ;;  %s421_s16 = scalar_lea.sflag [#allocation3], %s420_s15 }
  0x65   : > { %s2262_s24 = scalar_lea.vmem [#allocation5], %s1448_s29 }
  0x66   : > { %2018 = dma.done.wait (%p2579_p2), %s421_s16, 1024  }
  0x67   : > { %2020 = vsyncadd (%p2579_p2), %s421_s16, 4294966272  ;;  %s430_s5 = scalar_lea.sflag [#allocation7], %s420_s15  ;;  %s2268_s21 = scalar_lea.vmem [#allocation6], %s1448_s29 }
  0x68   : > { %2022 = dma.done.wait (%p2579_p2), %s430_s5, 1024  }
  0x69   : > { %2024 = vsyncadd (%p2579_p2), %s430_s5, 4294966272 }
  0x6a   : > { %438 = sfence }
  0x6b   : > { %v1914_v0 = vld [vmem:[%s2559_s7] sm:$0xff]   ;;  %s1450_s0 = sshll.u32 %s2120_s17, 4  ;;  %v1915_v1 = vld [vmem:[%s2559_s7 + $0x8] sm:$0xff]   ;;  %v1916_v2 = vld [vmem:[%s2559_s7 + $0x10] sm:$0xff]   ;;  %s2313_s22 = sld [smem:[#allocation2]]  ;;  %vm1251_vm0 = vcmask 1040384  }
  0x6c   : > { %p501_p5 = scmp.lt.s32.totalorder %s1450_s0, 31  ;;  %1809 = vmatprep.subr.bf16.mxu0 %v1914_v0  ;;  %1841 = vmatprep.subr.bf16.mxu1 %v1914_v0  ;;  %v1917_v3 = vld [vmem:[%s2559_s7 + $0x18] sm:$0xff]   ;;  %s2316_s28 = sld [smem:[#allocation2 + $0x1]]  ;;  %v1641_v16 = vld [vmem:[%s2262_s24] sm:$0xff]   ;;  %v1772_v31 = vld [vmem:[%s2262_s24 + $0x8] sm:$0xff]  }
  0x6d   : > { %1810 = vmatpush3.bf16.msra.mxu0 %v1914_v0  ;;  %1849 = vmatpush3.bf16.msra.mxu1 %v1914_v0  ;;  %s2319_s20 = sld [smem:[#allocation2 + $0x2]]  ;;  %s2322_s30 = sld [smem:[#allocation2 + $0x3]]  ;;  %v1673_v17 = vld [vmem:[%s2268_s21] sm:$0xff]   ;;  %v1642_v18 = vunpack.c.l.bf16 %v1641_v16  ;;  %v1643_v19 = vunpack.c.h.bf16 %v1641_v16  ;;  %v1646_v38 = vunpack.c.l.bf16 %v1772_v31  ;;  %v1647_v39 = vunpack.c.h.bf16 %v1772_v31  ;;  %v1919_v44 = vld [vmem:[%s2559_s7 + $0x28] sm:$0xff]   ;;  %v1920_v62 = vld [vmem:[%s2559_s7 + $0x30] sm:$0xff]  }
  0x6e   : > { %s2586_s0 = smov (!%p501_p5, %s1450_s0), 31  ;;  %1811 = vmatprep.subr.bf16.mxu0 %v1915_v1  ;;  %1842 = vmatprep.subr.bf16.mxu1 %v1915_v1  ;;  %s2325_s26 = sld [smem:[#allocation2 + $0x4]]  ;;  %v1674_v20 = vunpack.c.l.bf16 %v1673_v17  ;;  %v1675_v21 = vunpack.c.h.bf16 %v1673_v17  ;;  %v1918_v25 = vld [vmem:[%s2559_s7 + $0x20] sm:$0xff]   ;;  %v1779_v49 = vld [vmem:[%s2268_s21 + $0x8] sm:$0xff]   ;;  %v1921_v17 = vld [vmem:[%s2559_s7 + $0x38] sm:$0xff]  }
  0x6f   : > { %s2284_s11 = sshll.u32 %s2586_s0, 2  ;;  %s2328_s13 = sld [smem:[#allocation2 + $0x5]]  ;;  %v1678_v61 = vunpack.c.l.bf16 %v1779_v49 }
  0x70   : > { %s2290_s25 = scalar_lea.vmem %s2553_s1, %s2284_s11  ;;  %s2296_s15 = scalar_lea.vmem %s2554_s2, %s2284_s11 }
  0x71   : > { %1812 = vmatpush3.bf16.msra.mxu0 %v1915_v1  ;;  %1850 = vmatpush3.bf16.msra.mxu1 %v1915_v1  ;;  %s2305_s27 = scalar_lea.vmem %s2555_s3, %s2284_s11  ;;  %s2311_s12 = scalar_lea.vmem %s2556_s4, %s2284_s11  ;;  %v1513_v4 = vld [vmem:[%s2290_s25] sm:$0xff]   ;;  %v1744_v22 = vld [vmem:[%s2290_s25 + $0x8] sm:$0xff]   ;;  %v2340_v36 = vstv %s2313_s22  ;;  %v1752_v16 = vld [vmem:[%s2296_s15 + $0x10] sm:$0xff]  }
  0x72   : > { %1813 = vmatprep.subr.bf16.mxu0 %v1916_v2  ;;  %1843 = vmatprep.subr.bf16.mxu1 %v1916_v2  ;;  %v1545_v5 = vld [vmem:[%s2296_s15] sm:$0xff]   ;;  %v1514_v6 = vunpack.c.l.bf16 %v1513_v4  ;;  %v1515_v7 = vunpack.c.h.bf16 %v1513_v4  ;;  %v1751_v23 = vld [vmem:[%s2296_s15 + $0x8] sm:$0xff]   ;;  %v1518_v26 = vunpack.c.l.bf16 %v1744_v22  ;;  %v1519_v27 = vunpack.c.h.bf16 %v1744_v22  ;;  %v1766_v31 = vld [vmem:[%s2311_s12 + $0x10] sm:$0xff]   ;;  %p532_p13 = scmp.lt.s32.totalorder %s2120_s17, 1 }
  0x73   : > { %v1546_v8 = vunpack.c.l.bf16 %v1545_v5  ;;  %v1547_v9 = vunpack.c.h.bf16 %v1545_v5  ;;  %v1577_v10 = vld [vmem:[%s2305_s27] sm:$0xff]   ;;  %v1758_v24 = vld [vmem:[%s2305_s27 + $0x8] sm:$0xff]   ;;  %v1550_v28 = vunpack.c.l.bf16 %v1751_v23  ;;  %v1551_v29 = vunpack.c.h.bf16 %v1751_v23 }
  0x74   : > { %v1609_v11 = vld [vmem:[%s2311_s12] sm:$0xff]   ;;  %v1578_v12 = vunpack.c.l.bf16 %v1577_v10  ;;  %v1579_v13 = vunpack.c.h.bf16 %v1577_v10  ;;  %v1765_v30 = vld [vmem:[%s2311_s12 + $0x8] sm:$0xff]   ;;  %v1582_v32 = vunpack.c.l.bf16 %v1758_v24  ;;  %v1583_v33 = vunpack.c.h.bf16 %v1758_v24  ;;  %s2588_s17 = smov (!%p532_p13, %s2120_s17), 1 }
  0x75   : > { %v1610_v14 = vunpack.c.l.bf16 %v1609_v11  ;;  %v1611_v15 = vunpack.c.h.bf16 %v1609_v11  ;;  %1814 = vmatpush3.bf16.msra.mxu0 %v1916_v2  ;;  %1851 = vmatpush3.bf16.msra.mxu1 %v1916_v2  ;;  %v1614_v34 = vunpack.c.l.bf16 %v1765_v30  ;;  %v1615_v35 = vunpack.c.h.bf16 %v1765_v30  ;;  %v1745_v11 = vld [vmem:[%s2290_s25 + $0x10] sm:$0xff]  }
  0x76   : > { %1815 = vmatprep.subr.bf16.mxu0 %v1917_v3  ;;  %1844 = vmatprep.subr.bf16.mxu1 %v1917_v3  ;;  %v2343_v37 = vstv %s2316_s28  ;;  %v571_v40 = vmul.f32 %v1514_v6, %v2340_v36  ;;  %v572_v41 = vmul.f32 %v1515_v7, %v2340_v36  ;;  %v2349_v43 = vstv %s2319_s20 }
  0x77   : > { %v621_v42 = vmul.f32 %v1546_v8, %v2343_v37  ;;  %v622_v45 = vmul.f32 %v1547_v9, %v2343_v37  ;;  %v687_v46 = vmul.f32 %v1578_v12, %v2349_v43  ;;  %v688_v47 = vmul.f32 %v1579_v13, %v2349_v43 }
  0x78   : > { %v2358_v48 = vstv %s2322_s30  ;;  %v2364_v53 = vstv %s2325_s26  ;;  %v2369_v57 = vstv %s2328_s13  ;;  %v573_v0 = vmul.f32 %v1518_v26, %v2340_v36  ;;  %v1759_v26 = vld [vmem:[%s2305_s27 + $0x10] sm:$0xff]  }
  0x79   : > { %1816 = vmatpush3.bf16.msra.mxu0 %v1917_v3  ;;  %1852 = vmatpush3.bf16.msra.mxu1 %v1917_v3  ;;  %v637_v50 = vadd.f32 %v621_v42, %v571_v40  ;;  %v753_v51 = vmul.f32 %v1610_v14, %v2358_v48  ;;  %v754_v52 = vmul.f32 %v1611_v15, %v2358_v48  ;;  %v1522_v24 = vunpack.c.l.bf16 %v1745_v11 }
  0x7a   : > { %1817 = vmatprep.subr.bf16.mxu0 %v1918_v25  ;;  %1845 = vmatprep.subr.bf16.mxu1 %v1918_v25  ;;  %v638_v54 = vadd.f32 %v622_v45, %v572_v41  ;;  %v819_v55 = vmul.f32 %v1642_v18, %v2364_v53  ;;  %v820_v56 = vmul.f32 %v1643_v19, %v2364_v53  ;;  %v1554_v30 = vunpack.c.l.bf16 %v1752_v16 }
  0x7b   : > { %v703_v58 = vadd.f32 %v687_v46, %v637_v50  ;;  %v885_v59 = vmul.f32 %v1674_v20, %v2369_v57  ;;  %v886_v60 = vmul.f32 %v1675_v21, %v2369_v57  ;;  %v574_v1 = vmul.f32 %v1519_v27, %v2340_v36 }
  0x7c   : > { %v704_v63 = vadd.f32 %v688_v47, %v638_v54  ;;  %v623_v2 = vmul.f32 %v1550_v28, %v2343_v37  ;;  %v624_v4 = vmul.f32 %v1551_v29, %v2343_v37  ;;  %v689_v5 = vmul.f32 %v1582_v32, %v2349_v43  ;;  %v1773_v47 = vld [vmem:[%s2262_s24 + $0x10] sm:$0xff]  }
  0x7d   : > { %1818 = vmatpush3.bf16.msra.mxu0 %v1918_v25  ;;  %1853 = vmatpush3.bf16.msra.mxu1 %v1918_v25  ;;  %v769_v3 = vadd.f32 %v753_v51, %v703_v58  ;;  %v690_v6 = vmul.f32 %v1583_v33, %v2349_v43  ;;  %v755_v9 = vmul.f32 %v1614_v34, %v2358_v48  ;;  %v1679_v20 = vunpack.c.h.bf16 %v1779_v49  ;;  %v1780_v54 = vld [vmem:[%s2268_s21 + $0x10] sm:$0xff]  }
  0x7e   : > { %1819 = vmatprep.subr.bf16.mxu0 %v1919_v44  ;;  %1846 = vmatprep.subr.bf16.mxu1 %v1919_v44  ;;  %v770_v7 = vadd.f32 %v754_v52, %v704_v63  ;;  %v639_v8 = vadd.f32 %v623_v2, %v573_v0  ;;  %v756_v10 = vmul.f32 %v1615_v35, %v2358_v48  ;;  %v1523_v25 = vunpack.c.h.bf16 %v1745_v11 }
  0x7f   : > { %v835_v12 = vadd.f32 %v819_v55, %v769_v3  ;;  %v640_v13 = vadd.f32 %v624_v4, %v574_v1  ;;  %v821_v14 = vmul.f32 %v1646_v38, %v2364_v53  ;;  %v822_v15 = vmul.f32 %v1647_v39, %v2364_v53 }
  0x80   : > { %v836_v18 = vadd.f32 %v820_v56, %v770_v7  ;;  %v705_v19 = vadd.f32 %v689_v5, %v639_v8  ;;  %v887_v21 = vmul.f32 %v1678_v61, %v2369_v57  ;;  %v888_v29 = vmul.f32 %v1679_v20, %v2369_v57  ;;  %v1753_v5 = vld [vmem:[%s2296_s15 + $0x18] sm:$0xff]  }
  0x81   : > { %1820 = vmatpush3.bf16.msra.mxu0 %v1919_v44  ;;  %1854 = vmatpush3.bf16.msra.mxu1 %v1919_v44  ;;  %v901_v22 = vadd.f32 %v885_v59, %v835_v12  ;;  %v706_v23 = vadd.f32 %v690_v6, %v640_v13  ;;  %v575_v33 = vmul.f32 %v1522_v24, %v2340_v36  ;;  %v1555_v35 = vunpack.c.h.bf16 %v1752_v16  ;;  %v1774_v24 = vld [vmem:[%s2262_s24 + $0x18] sm:$0xff]  }
  0x82   : > { %1821 = vmatprep.subr.bf16.mxu0 %v1920_v62  ;;  %1847 = vmatprep.subr.bf16.mxu1 %v1920_v62  ;;  %v902_v27 = vadd.f32 %v886_v60, %v836_v18  ;;  %v771_v28 = vadd.f32 %v755_v9, %v705_v19  ;;  %v576_v34 = vmul.f32 %v1523_v25, %v2340_v36  ;;  %v1586_v41 = vunpack.c.l.bf16 %v1759_v26  ;;  %v1746_v60 = vld [vmem:[%s2290_s25 + $0x18] sm:$0xff]  }
  0x83   : > { %v772_v32 = vadd.f32 %v756_v10, %v706_v23  ;;  %v625_v40 = vmul.f32 %v1554_v30, %v2343_v37  ;;  %v626_v44 = vmul.f32 %v1555_v35, %v2343_v37  ;;  %v1587_v45 = vunpack.c.h.bf16 %v1759_v26  ;;  %v1760_v10 = vld [vmem:[%s2305_s27 + $0x18] sm:$0xff]  }
  0x84   : > { %v917_v38 = vpack.c.bf16 %v902_v27, %v901_v22  ;;  %v837_v39 = vadd.f32 %v821_v14, %v771_v28  ;;  %v1618_v46 = vunpack.c.l.bf16 %v1766_v31  ;;  %v691_v51 = vmul.f32 %v1586_v41, %v2349_v43 }
  0x85   : > { %1822 = vmatpush3.bf16.msra.mxu0 %v1920_v62  ;;  %1855 = vmatpush3.bf16.msra.mxu1 %v1920_v62  ;;  %v838_v42 = vadd.f32 %v822_v15, %v772_v32  ;;  %v641_v50 = vadd.f32 %v625_v40, %v575_v33  ;;  %v1619_v52 = vunpack.c.h.bf16 %v1766_v31  ;;  %v642_v56 = vadd.f32 %v626_v44, %v576_v34  ;;  %v1767_v15 = vld [vmem:[%s2311_s12 + $0x18] sm:$0xff]   ;;  %v1747_v40 = vld [vmem:[%s2290_s25 + $0x20] sm:$0xff]  }
  0x86   : > { %1823 = vmatprep.subr.bf16.mxu0 %v1921_v17  ;;  %1848 = vmatprep.subr.bf16.mxu1 %v1921_v17  ;;  %v903_v49 = vadd.f32 %v887_v21, %v837_v39  ;;  %v692_v58 = vmul.f32 %v1587_v45, %v2349_v43  ;;  %v757_v59 = vmul.f32 %v1618_v46, %v2358_v48  ;;  %v1650_v63 = vunpack.c.l.bf16 %v1773_v47  ;;  %v1754_v46 = vld [vmem:[%s2296_s15 + $0x20] sm:$0xff]  }
  0x87   : > { %1825 = vmatprep.mubr.bf16.mxu0 %v917_v38  ;;  %v904_v55 = vadd.f32 %v888_v29, %v838_v42  ;;  %v707_v61 = vadd.f32 %v691_v51, %v641_v50  ;;  %v758_v62 = vmul.f32 %v1619_v52, %v2358_v48  ;;  %v1651_v0 = vunpack.c.h.bf16 %v1773_v47  ;;  %v1781_v29 = vld [vmem:[%s2268_s21 + $0x18] sm:$0xff]   ;;  %v1761_v52 = vld [vmem:[%s2305_s27 + $0x20] sm:$0xff]  }
  0x88   : > { %v708_v2 = vadd.f32 %v692_v58, %v642_v56  ;;  %v1682_v3 = vunpack.c.l.bf16 %v1780_v54  ;;  %v1683_v4 = vunpack.c.h.bf16 %v1780_v54  ;;  %v823_v7 = vmul.f32 %v1650_v63, %v2364_v53  ;;  %v1768_v63 = vld [vmem:[%s2311_s12 + $0x20] sm:$0xff]  }
  0x89   : > { %1824 = vmatpush3.bf16.msra.mxu0 %v1921_v17  ;;  %1856 = vmatpush3.bf16.msra.mxu1 %v1921_v17  ;;  %v918_v1 = vpack.c.bf16 %v904_v55, %v903_v49  ;;  %v773_v6 = vadd.f32 %v757_v59, %v707_v61  ;;  %v824_v8 = vmul.f32 %v1651_v0, %v2364_v53  ;;  %v1526_v9 = vunpack.c.l.bf16 %v1746_v60 }
  0x8a   : > { %v774_v11 = vadd.f32 %v758_v62, %v708_v2  ;;  %v889_v12 = vmul.f32 %v1682_v3, %v2369_v57  ;;  %v890_v13 = vmul.f32 %v1683_v4, %v2369_v57  ;;  %v1527_v14 = vunpack.c.h.bf16 %v1746_v60 }
  0x8b   : > { %v839_v16 = vadd.f32 %v823_v7, %v773_v6  ;;  %v577_v17 = vmul.f32 %v1526_v9, %v2340_v36  ;;  %v1558_v18 = vunpack.c.l.bf16 %v1753_v5  ;;  %v1559_v19 = vunpack.c.h.bf16 %v1753_v5 }
  0x8c   : > { %1826 = vmatmul.mubr.bf16.vlgmr.msra.gmra.mrb[0].mxu0 %v918_v1  ;;  %v840_v20 = vadd.f32 %v824_v8, %v774_v11  ;;  %v578_v21 = vmul.f32 %v1527_v14, %v2340_v36  ;;  %v1590_v22 = vunpack.c.l.bf16 %v1760_v10  ;;  %v1591_v23 = vunpack.c.h.bf16 %v1760_v10  ;;  %v1775_v8 = vld [vmem:[%s2262_s24 + $0x20] sm:$0xff]  }
  0x8d   : > { %v905_v25 = vadd.f32 %v889_v12, %v839_v16  ;;  %v627_v26 = vmul.f32 %v1558_v18, %v2343_v37  ;;  %v628_v27 = vmul.f32 %v1559_v19, %v2343_v37  ;;  %v1622_v28 = vunpack.c.l.bf16 %v1767_v15  ;;  %v1748_v18 = vld [vmem:[%s2290_s25 + $0x28] sm:$0xff]  }
  0x8e   : > { %v906_v30 = vadd.f32 %v890_v13, %v840_v20  ;;  %v693_v31 = vmul.f32 %v1590_v22, %v2349_v43  ;;  %v694_v32 = vmul.f32 %v1591_v23, %v2349_v43  ;;  %v1623_v33 = vunpack.c.h.bf16 %v1767_v15  ;;  %v1782_v13 = vld [vmem:[%s2268_s21 + $0x20] sm:$0xff]  }
  0x8f   : > { %v643_v34 = vadd.f32 %v627_v26, %v577_v17  ;;  %v644_v35 = vadd.f32 %v628_v27, %v578_v21  ;;  %v759_v38 = vmul.f32 %v1622_v28, %v2358_v48  ;;  %v1654_v39 = vunpack.c.l.bf16 %v1774_v24  ;;  %v1755_v27 = vld [vmem:[%s2296_s15 + $0x28] sm:$0xff]  }
  0x90   : > { %v919_v41 = vpack.c.bf16 %v906_v30, %v905_v25  ;;  %v760_v42 = vmul.f32 %v1623_v33, %v2358_v48  ;;  %v1655_v44 = vunpack.c.h.bf16 %v1774_v24  ;;  %v1686_v45 = vunpack.c.l.bf16 %v1781_v29 }
  0x91   : > { %v709_v47 = vadd.f32 %v693_v31, %v643_v34  ;;  %v710_v49 = vadd.f32 %v694_v32, %v644_v35  ;;  %v825_v50 = vmul.f32 %v1654_v39, %v2364_v53  ;;  %v1687_v51 = vunpack.c.h.bf16 %v1781_v29  ;;  %v1762_v32 = vld [vmem:[%s2305_s27 + $0x28] sm:$0xff]  }
  0x92   : > { %1829 = vmatprep.mubr.bf16.mxu0 %v919_v41  ;;  %v826_v54 = vmul.f32 %v1655_v44, %v2364_v53  ;;  %v891_v55 = vmul.f32 %v1686_v45, %v2369_v57  ;;  %v1530_v56 = vunpack.c.l.bf16 %v1747_v40  ;;  %v1531_v58 = vunpack.c.h.bf16 %v1747_v40  ;;  %v1769_v39 = vld [vmem:[%s2311_s12 + $0x28] sm:$0xff]  }
  0x93   : > { %v775_v59 = vadd.f32 %v759_v38, %v709_v47  ;;  %v776_v60 = vadd.f32 %v760_v42, %v710_v49  ;;  %v892_v61 = vmul.f32 %v1687_v51, %v2369_v57  ;;  %v1562_v62 = vunpack.c.l.bf16 %v1754_v46 }
  0x94   : > { %v579_v0 = vmul.f32 %v1530_v56, %v2340_v36  ;;  %v580_v1 = vmul.f32 %v1531_v58, %v2340_v36  ;;  %v1563_v2 = vunpack.c.h.bf16 %v1754_v46  ;;  %v1594_v3 = vunpack.c.l.bf16 %v1761_v52 }
  0x95   : > { %v841_v4 = vadd.f32 %v825_v50, %v775_v59  ;;  %v842_v5 = vadd.f32 %v826_v54, %v776_v60  ;;  %v629_v6 = vmul.f32 %v1562_v62, %v2343_v37  ;;  %v1595_v7 = vunpack.c.h.bf16 %v1761_v52 }
  0x96   : > { %v630_v9 = vmul.f32 %v1563_v2, %v2343_v37  ;;  %v695_v10 = vmul.f32 %v1594_v3, %v2349_v43  ;;  %v1626_v11 = vunpack.c.l.bf16 %v1768_v63  ;;  %v1627_v12 = vunpack.c.h.bf16 %v1768_v63  ;;  %v1749_v2 = vld [vmem:[%s2290_s25 + $0x30] sm:$0xff]  }
  0x97   : > { %v907_v14 = vadd.f32 %v891_v55, %v841_v4  ;;  %v908_v15 = vadd.f32 %v892_v61, %v842_v5  ;;  %v645_v16 = vadd.f32 %v629_v6, %v579_v0  ;;  %v696_v17 = vmul.f32 %v1595_v7, %v2349_v43  ;;  %v1776_v55 = vld [vmem:[%s2262_s24 + $0x28] sm:$0xff]  }
  0x98   : > { %v646_v19 = vadd.f32 %v630_v9, %v580_v1  ;;  %v761_v20 = vmul.f32 %v1626_v11, %v2358_v48  ;;  %v762_v21 = vmul.f32 %v1627_v12, %v2358_v48  ;;  %v1658_v22 = vunpack.c.l.bf16 %v1775_v8  ;;  %v1783_v61 = vld [vmem:[%s2268_s21 + $0x28] sm:$0xff]   ;;  %v1756_v11 = vld [vmem:[%s2296_s15 + $0x30] sm:$0xff]  }
  0x99   : > { %v920_v23 = vpack.c.bf16 %v908_v15, %v907_v14  ;;  %v711_v24 = vadd.f32 %v695_v10, %v645_v16  ;;  %v1659_v25 = vunpack.c.h.bf16 %v1775_v8  ;;  %v1690_v26 = vunpack.c.l.bf16 %v1782_v13  ;;  %v1763_v16 = vld [vmem:[%s2305_s27 + $0x30] sm:$0xff]  }
  0x9a   : > { %v712_v28 = vadd.f32 %v696_v17, %v646_v19  ;;  %v827_v29 = vmul.f32 %v1658_v22, %v2364_v53  ;;  %v1691_v30 = vunpack.c.h.bf16 %v1782_v13  ;;  %v1534_v31 = vunpack.c.l.bf16 %v1748_v18 }
  0x9b   : > { %1830 = vmatmul.mubr.bf16.gmra.mrb[4].mxu0 %v920_v23  ;;  %v777_v33 = vadd.f32 %v761_v20, %v711_v24  ;;  %v828_v34 = vmul.f32 %v1659_v25, %v2364_v53  ;;  %v893_v35 = vmul.f32 %v1690_v26, %v2369_v57  ;;  %v1535_v38 = vunpack.c.h.bf16 %v1748_v18 }
  0x9c   : > { %v778_v40 = vadd.f32 %v762_v21, %v712_v28  ;;  %v894_v41 = vmul.f32 %v1691_v30, %v2369_v57  ;;  %v581_v42 = vmul.f32 %v1534_v31, %v2340_v36  ;;  %v1566_v44 = vunpack.c.l.bf16 %v1755_v27  ;;  %v1770_v21 = vld [vmem:[%s2311_s12 + $0x30] sm:$0xff]  }
  0x9d   : > { %v843_v45 = vadd.f32 %v827_v29, %v777_v33  ;;  %v582_v46 = vmul.f32 %v1535_v38, %v2340_v36  ;;  %v1567_v47 = vunpack.c.h.bf16 %v1755_v27  ;;  %v1598_v49 = vunpack.c.l.bf16 %v1762_v32 }
  0x9e   : > { %v844_v50 = vadd.f32 %v828_v34, %v778_v40  ;;  %v631_v51 = vmul.f32 %v1566_v44, %v2343_v37  ;;  %v1599_v52 = vunpack.c.h.bf16 %v1762_v32  ;;  %v1630_v54 = vunpack.c.l.bf16 %v1769_v39  ;;  %v1777_v34 = vld [vmem:[%s2262_s24 + $0x30] sm:$0xff]  }
  0x9f   : > { %v909_v56 = vadd.f32 %v893_v35, %v843_v45  ;;  %v632_v58 = vmul.f32 %v1567_v47, %v2343_v37  ;;  %v697_v59 = vmul.f32 %v1598_v49, %v2349_v43  ;;  %v1631_v60 = vunpack.c.h.bf16 %v1769_v39  ;;  %v1784_v35 = vld [vmem:[%s2268_s21 + $0x30] sm:$0xff]   ;;  %v1750_v47 = vld [vmem:[%s2290_s25 + $0x38] sm:$0xff]  }
  0xa0   : > { %v910_v62 = vadd.f32 %v894_v41, %v844_v50  ;;  %v647_v63 = vadd.f32 %v631_v51, %v581_v42  ;;  %v698_v0 = vmul.f32 %v1599_v52, %v2349_v43  ;;  %v763_v1 = vmul.f32 %v1630_v54, %v2358_v48 }
  0xa1   : > { %v648_v3 = vadd.f32 %v632_v58, %v582_v46  ;;  %v764_v4 = vmul.f32 %v1631_v60, %v2358_v48  ;;  %v1662_v5 = vunpack.c.l.bf16 %v1776_v55  ;;  %v1663_v6 = vunpack.c.h.bf16 %v1776_v55  ;;  %v1764_v60 = vld [vmem:[%s2305_s27 + $0x38] sm:$0xff]   ;;  %s2512_s27 = scalar_lea.vmem %s2561_s9, %s2284_s11  ;;  %s1491_s11 = sld [smem:[#allocation2 + $0x6]] }
  0xa2   : > { %v921_v7 = vpack.c.bf16 %v910_v62, %v909_v56  ;;  %v713_v8 = vadd.f32 %v697_v59, %v647_v63  ;;  %v1694_v9 = vunpack.c.l.bf16 %v1783_v61  ;;  %v1695_v10 = vunpack.c.h.bf16 %v1783_v61  ;;  %v1757_v59 = vld [vmem:[%s2296_s15 + $0x38] sm:$0xff]  }
  0xa3   : > { %v714_v12 = vadd.f32 %v698_v0, %v648_v3  ;;  %v829_v13 = vmul.f32 %v1662_v5, %v2364_v53  ;;  %v830_v14 = vmul.f32 %v1663_v6, %v2364_v53  ;;  %v1538_v15 = vunpack.c.l.bf16 %v1749_v2  ;;  %v1771_v5 = vld [vmem:[%s2311_s12 + $0x38] sm:$0xff]   ;;  %s1460_s12 = sshll.u32 %s2588_s17, 1 }
  0xa4   : > { %1833 = vmatprep.mubr.bf16.mxu1 %v921_v7  ;;  %v779_v17 = vadd.f32 %v763_v1, %v713_v8  ;;  %v895_v18 = vmul.f32 %v1694_v9, %v2369_v57  ;;  %v896_v19 = vmul.f32 %v1695_v10, %v2369_v57  ;;  %v1539_v20 = vunpack.c.h.bf16 %v1749_v2  ;;  %s535_s26 = scalar_lea.vmem %s2562_s10, %s1460_s12 }
  0xa5   : > { %v780_v22 = vadd.f32 %v764_v4, %v714_v12  ;;  %v583_v23 = vmul.f32 %v1538_v15, %v2340_v36  ;;  %v1570_v24 = vunpack.c.l.bf16 %v1756_v11  ;;  %v1571_v25 = vunpack.c.h.bf16 %v1756_v11 }
  0xa6   : > { %v845_v26 = vadd.f32 %v829_v13, %v779_v17  ;;  %v584_v27 = vmul.f32 %v1539_v20, %v2340_v36  ;;  %v1602_v28 = vunpack.c.l.bf16 %v1763_v16  ;;  %v1603_v29 = vunpack.c.h.bf16 %v1763_v16 }
  0xa7   : > { %v846_v30 = vadd.f32 %v830_v14, %v780_v22  ;;  %v633_v31 = vmul.f32 %v1570_v24, %v2343_v37  ;;  %v634_v32 = vmul.f32 %v1571_v25, %v2343_v37  ;;  %v1634_v33 = vunpack.c.l.bf16 %v1770_v21  ;;  %v1778_v14 = vld [vmem:[%s2262_s24 + $0x38] sm:$0xff]  }
  0xa8   : > { %v911_v38 = vadd.f32 %v895_v18, %v845_v26  ;;  %v699_v39 = vmul.f32 %v1602_v28, %v2349_v43  ;;  %v700_v40 = vmul.f32 %v1603_v29, %v2349_v43  ;;  %v1635_v41 = vunpack.c.h.bf16 %v1770_v21 }
  0xa9   : > { %v912_v42 = vadd.f32 %v896_v19, %v846_v30  ;;  %v649_v44 = vadd.f32 %v633_v31, %v583_v23  ;;  %v650_v45 = vadd.f32 %v634_v32, %v584_v27  ;;  %v765_v46 = vmul.f32 %v1634_v33, %v2358_v48  ;;  %v1785_v19 = vld [vmem:[%s2268_s21 + $0x38] sm:$0xff]  }
  0xaa   : > { %v766_v49 = vmul.f32 %v1635_v41, %v2358_v48  ;;  %v1666_v50 = vunpack.c.l.bf16 %v1777_v34  ;;  %v1667_v51 = vunpack.c.h.bf16 %v1777_v34  ;;  %v1698_v52 = vunpack.c.l.bf16 %v1784_v35 }
  0xab   : > { %v922_v54 = vpack.c.bf16 %v912_v42, %v911_v38  ;;  %v715_v55 = vadd.f32 %v699_v39, %v649_v44  ;;  %v716_v56 = vadd.f32 %v700_v40, %v650_v45  ;;  %v1699_v58 = vunpack.c.h.bf16 %v1784_v35  ;;  %v2502_v45 = vld [vmem:[%s2560_s8] ss:$0 sm:$0xff] }
  0xac   : > { %v831_v61 = vmul.f32 %v1666_v50, %v2364_v53  ;;  %v832_v62 = vmul.f32 %v1667_v51, %v2364_v53  ;;  %v897_v63 = vmul.f32 %v1698_v52, %v2369_v57  ;;  %v1542_v0 = vunpack.c.l.bf16 %v1750_v47 }
  0xad   : > { %1834 = vmatmul.mubr.bf16.vlgmr.msra.gmra.mrb[0].mxu1 %v922_v54  ;;  %v781_v1 = vadd.f32 %v765_v46, %v715_v55  ;;  %v782_v2 = vadd.f32 %v766_v49, %v716_v56  ;;  %v898_v3 = vmul.f32 %v1699_v58, %v2369_v57  ;;  %v1543_v4 = vunpack.c.h.bf16 %v1750_v47 }
  0xae   : > { %v585_v6 = vmul.f32 %v1542_v0, %v2340_v36  ;;  %v1574_v7 = vunpack.c.l.bf16 %v1757_v59  ;;  %v1575_v8 = vunpack.c.h.bf16 %v1757_v59  ;;  %v1606_v9 = vunpack.c.l.bf16 %v1764_v60 }
  0xaf   : > { %v847_v10 = vadd.f32 %v831_v61, %v781_v1  ;;  %v848_v11 = vadd.f32 %v832_v62, %v782_v2  ;;  %v586_v12 = vmul.f32 %v1543_v4, %v2340_v36  ;;  %v1607_v13 = vunpack.c.h.bf16 %v1764_v60 }
  0xb0   : > { %v635_v15 = vmul.f32 %v1574_v7, %v2343_v37  ;;  %v636_v16 = vmul.f32 %v1575_v8, %v2343_v37  ;;  %v701_v17 = vmul.f32 %v1606_v9, %v2349_v43  ;;  %v1638_v18 = vunpack.c.l.bf16 %v1771_v5 }
  0xb1   : > { %v913_v20 = vadd.f32 %v897_v63, %v847_v10  ;;  %v914_v21 = vadd.f32 %v898_v3, %v848_v11  ;;  %v702_v22 = vmul.f32 %v1607_v13, %v2349_v43  ;;  %v1639_v23 = vunpack.c.h.bf16 %v1771_v5 }
  0xb2   : > { %v651_v24 = vadd.f32 %v635_v15, %v585_v6  ;;  %v652_v25 = vadd.f32 %v636_v16, %v586_v12  ;;  %v767_v26 = vmul.f32 %v1638_v18, %v2358_v48  ;;  %v1670_v36 = vunpack.c.l.bf16 %v1778_v14 }
  0xb3   : > { %v923_v27 = vpack.c.bf16 %v914_v21, %v913_v20  ;;  %v768_v28 = vmul.f32 %v1639_v23, %v2358_v48  ;;  %v1671_v29 = vunpack.c.h.bf16 %v1778_v14  ;;  %v1702_v30 = vunpack.c.l.bf16 %v1785_v19 }
  0xb4   : > { %v717_v37 = vadd.f32 %v701_v17, %v651_v24  ;;  %v718_v31 = vadd.f32 %v702_v22, %v652_v25  ;;  %v833_v32 = vmul.f32 %v1670_v36, %v2364_v53  ;;  %v1703_v33 = vunpack.c.h.bf16 %v1785_v19 }
  0xb5   : > { %1837 = vmatprep.mubr.bf16.mxu1 %v923_v27  ;;  %v834_v34 = vmul.f32 %v1671_v29, %v2364_v53  ;;  %v899_v38 = vmul.f32 %v1702_v30, %v2369_v57 }
  0xb6   : > { %v783_v43 = vadd.f32 %v767_v26, %v717_v37  ;;  %v784_v35 = vadd.f32 %v768_v28, %v718_v31  ;;  %v900_v39 = vmul.f32 %v1703_v33, %v2369_v57 }
  0xb8   : > { %v849_v40 = vadd.f32 %v833_v32, %v783_v43  ;;  %v850_v41 = vadd.f32 %v834_v34, %v784_v35 }
  0xba   : > { %v915_v42 = vadd.f32 %v899_v38, %v849_v40  ;;  %v916_v48 = vadd.f32 %v900_v39, %v850_v41 }
  0xbc   : > { %v924_v44 = vpack.c.bf16 %v916_v48, %v915_v42 }
  0xbe   : > { %1838 = vmatmul.mubr.bf16.gmra.mrb[4].mxu1 %v924_v44 }
 0x15f   : > { %v1827_v46 = vpop.f32.mrb[0].mxu0 }
 0x160   : > { %v1039_v53 = vadd.f32 %v1827_v46, %v2502_v45  ;;  %v1030_v47 = vpop.f32.mrb[1].mxu0 }
 0x161   : > { %v1031_v49 = vadd.f32 %v2502_v45, %v1030_v47  ;;  %v1828_v50 = vpop.f32.mrb[2].mxu0 }
 0x162   : > { %v1042_v57 = vadd.f32 %v1828_v50, %v2502_v45  ;;  %v1033_v51 = vpop.f32.mrb[3].mxu0  ;;  %v1095_v55 = vmax.f32 %v1039_v53, 0.0 }
 0x163   : > { %v1093_v52 = vmax.f32 %v1031_v49, 0.0  ;;  %v1034_v54 = vadd.f32 %v2502_v45, %v1033_v51 }
 0x164   : > { %v1096_v56 = vmax.f32 %v1042_v57, 0.0  ;;  %v1215_v0 = vmul.f32 %v1095_v55, %v1095_v55 }
 0x165   : > { %v1094_v58 = vmax.f32 %v1034_v54, 0.0  ;;  %v1213_v60 = vmul.f32 %v1093_v52, %v1093_v52 }
 0x166   : > { %v1712_v59 = vpack.c.bf16 %v1096_v56, %v1095_v55  ;;  %v1216_v3 = vmul.f32 %v1096_v56, %v1096_v56 }
 0x167   : > { %v1707_v61 = vpack.c.bf16 %v1094_v58, %v1093_v52  ;;  %v1190_v62 = vadd.f32 %v1094_v58, %v1093_v52  ;;  %v1214_v63 = vmul.f32 %v1094_v58, %v1094_v58 }
 0x168   : > { %1786 = vst [vmem:[%s2512_s27 + $0x8] sm:$0xff] %v1712_v59  }
 0x169   : > { %1708 = vst [vmem:[%s2512_s27] sm:$0xff] %v1707_v61   ;;  %v1191_v1 = vadd.f32 %v1190_v62, %v1095_v55  ;;  %v1229_v2 = vadd.f32 %v1214_v63, %v1213_v60 }
 0x16b   : > { %v1230_v4 = vadd.f32 %v1229_v2, %v1215_v0  ;;  %v1192_v5 = vadd.f32 %v1191_v1, %v1096_v56 }
 0x16d   : > { %v1231_v6 = vadd.f32 %v1230_v4, %v1216_v3 }
 0x16e   : > { %v1831_v7 = vpop.f32.mrb[4].mxu0 }
 0x16f   : > { %v1055_v8 = vadd.f32 %v1831_v7, %v2502_v45  ;;  %v1046_v9 = vpop.f32.mrb[5].mxu0 }
 0x170   : > { %v1047_v10 = vadd.f32 %v2502_v45, %v1046_v9  ;;  %v1832_v11 = vpop.f32.mrb[6].mxu0 }
 0x171   : > { %v1058_v12 = vadd.f32 %v1832_v11, %v2502_v45  ;;  %v1049_v13 = vpop.f32.mrb[7].mxu0  ;;  %v1099_v16 = vmax.f32 %v1055_v8, 0.0 }
 0x172   : > { %v1097_v14 = vmax.f32 %v1047_v10, 0.0  ;;  %v1050_v15 = vadd.f32 %v2502_v45, %v1049_v13 }
 0x173   : > { %v1100_v17 = vmax.f32 %v1058_v12, 0.0  ;;  %v1219_v26 = vmul.f32 %v1099_v16, %v1099_v16 }
 0x174   : > { %v1193_v18 = vadd.f32 %v1192_v5, %v1097_v14  ;;  %v1217_v19 = vmul.f32 %v1097_v14, %v1097_v14  ;;  %v1098_v20 = vmax.f32 %v1050_v15, 0.0 }
 0x175   : > { %v1722_v21 = vpack.c.bf16 %v1100_v17, %v1099_v16  ;;  %v1220_v28 = vmul.f32 %v1100_v17, %v1100_v17 }
 0x176   : > { %v1232_v22 = vadd.f32 %v1231_v6, %v1217_v19  ;;  %v1717_v23 = vpack.c.bf16 %v1098_v20, %v1097_v14  ;;  %v1194_v24 = vadd.f32 %v1193_v18, %v1098_v20  ;;  %v1218_v25 = vmul.f32 %v1098_v20, %v1098_v20 }
 0x177   : > { %1788 = vst [vmem:[%s2512_s27 + $0x18] sm:$0xff] %v1722_v21  }
 0x178   : > { %1787 = vst [vmem:[%s2512_s27 + $0x10] sm:$0xff] %v1717_v23   ;;  %v1195_v36 = vadd.f32 %v1194_v24, %v1099_v16  ;;  %v1233_v27 = vadd.f32 %v1232_v22, %v1218_v25 }
 0x17a   : > { %v1234_v29 = vadd.f32 %v1233_v27, %v1219_v26  ;;  %v1196_v30 = vadd.f32 %v1195_v36, %v1100_v17 }
 0x17c   : > { %v1235_v37 = vadd.f32 %v1234_v29, %v1220_v28 }
 0x180   : > { %v1835_v31 = vpop.f32.mrb[0].mxu1 }
 0x181   : > { %v1071_v32 = vadd.f32 %v1835_v31, %v2502_v45  ;;  %v1062_v33 = vpop.f32.mrb[1].mxu1 }
 0x182   : > { %v1063_v34 = vadd.f32 %v2502_v45, %v1062_v33  ;;  %v1836_v43 = vpop.f32.mrb[2].mxu1 }
 0x183   : > { %v1103_v35 = vmax.f32 %v1071_v32, 0.0  ;;  %v1074_v38 = vadd.f32 %v1836_v43, %v2502_v45  ;;  %v1065_v39 = vpop.f32.mrb[3].mxu1 }
 0x184   : > { %v1101_v40 = vmax.f32 %v1063_v34, 0.0  ;;  %v1066_v41 = vadd.f32 %v2502_v45, %v1065_v39 }
 0x185   : > { %v1104_v42 = vmax.f32 %v1074_v38, 0.0  ;;  %v1223_v51 = vmul.f32 %v1103_v35, %v1103_v35 }
 0x186   : > { %v1197_v48 = vadd.f32 %v1196_v30, %v1101_v40  ;;  %v1221_v44 = vmul.f32 %v1101_v40, %v1101_v40  ;;  %v1102_v46 = vmax.f32 %v1066_v41, 0.0 }
 0x187   : > { %v1732_v53 = vpack.c.bf16 %v1104_v42, %v1103_v35  ;;  %v1224_v55 = vmul.f32 %v1104_v42, %v1104_v42 }
 0x188   : > { %v1236_v47 = vadd.f32 %v1235_v37, %v1221_v44  ;;  %v1727_v49 = vpack.c.bf16 %v1102_v46, %v1101_v40  ;;  %v1198_v50 = vadd.f32 %v1197_v48, %v1102_v46  ;;  %v1222_v57 = vmul.f32 %v1102_v46, %v1102_v46 }
 0x189   : > { %1790 = vst [vmem:[%s2512_s27 + $0x28] sm:$0xff] %v1732_v53   ;;  %v1211_v37 = vstv %s1491_s11 }
 0x18a   : > { %1789 = vst [vmem:[%s2512_s27 + $0x20] sm:$0xff] %v1727_v49   ;;  %v1199_v52 = vadd.f32 %v1198_v50, %v1103_v35  ;;  %v1237_v54 = vadd.f32 %v1236_v47, %v1222_v57 }
 0x18c   : > { %v1238_v56 = vadd.f32 %v1237_v54, %v1223_v51  ;;  %v1200_v58 = vadd.f32 %v1199_v52, %v1104_v42 }
 0x18e   : > { %v1239_v59 = vadd.f32 %v1238_v56, %v1224_v55 }
 0x191   : > { %v1839_v60 = vpop.f32.mrb[4].mxu1 }
 0x192   : > { %v1087_v61 = vadd.f32 %v1839_v60, %v2502_v45  ;;  %v1078_v62 = vpop.f32.mrb[5].mxu1 }
 0x193   : > { %v1079_v63 = vadd.f32 %v2502_v45, %v1078_v62  ;;  %v1840_v0 = vpop.f32.mrb[6].mxu1 }
 0x194   : > { %v1107_v1 = vmax.f32 %v1087_v61, 0.0  ;;  %v1090_v2 = vadd.f32 %v1840_v0, %v2502_v45  ;;  %v1081_v3 = vpop.f32.mrb[7].mxu1 }
 0x195   : > { %v1105_v4 = vmax.f32 %v1079_v63, 0.0  ;;  %v1082_v5 = vadd.f32 %v2502_v45, %v1081_v3 }
 0x196   : > { %v1108_v6 = vmax.f32 %v1090_v2, 0.0  ;;  %v1227_v15 = vmul.f32 %v1107_v1, %v1107_v1 }
 0x197   : > { %v1201_v7 = vadd.f32 %v1200_v58, %v1105_v4  ;;  %v1225_v8 = vmul.f32 %v1105_v4, %v1105_v4  ;;  %v1106_v9 = vmax.f32 %v1082_v5, 0.0 }
 0x198   : > { %v1742_v10 = vpack.c.bf16 %v1108_v6, %v1107_v1  ;;  %v1228_v18 = vmul.f32 %v1108_v6, %v1108_v6 }
 0x199   : > { %v1240_v11 = vadd.f32 %v1239_v59, %v1225_v8  ;;  %v1737_v12 = vpack.c.bf16 %v1106_v9, %v1105_v4  ;;  %v1202_v13 = vadd.f32 %v1201_v7, %v1106_v9  ;;  %v1226_v14 = vmul.f32 %v1106_v9, %v1106_v9 }
 0x19a   : > { %1792 = vst [vmem:[%s2512_s27 + $0x38] sm:$0xff] %v1742_v10  }
 0x19b   : > { %1791 = vst [vmem:[%s2512_s27 + $0x30] sm:$0xff] %v1737_v12   ;;  %v1203_v16 = vadd.f32 %v1202_v13, %v1107_v1  ;;  %v1241_v17 = vadd.f32 %v1240_v11, %v1226_v14 }
 0x19d   : > { %v1204_v19 = vadd.f32 %v1203_v16, %v1108_v6  ;;  %v1242_v20 = vadd.f32 %v1241_v17, %v1227_v15 }
 0x19f   : > { %v1205_v45 = vrot.slane %v1204_v19, 4  ;;  %v1243_v21 = vadd.f32 %v1242_v20, %v1228_v18 }
 0x1a1   : > { %v1206_v22 = vadd.f32 %v1205_v45, %v1204_v19  ;;  %v1244_v23 = vrot.slane %v1243_v21, 4 }
 0x1a3   : > { %v1207_v24 = vrot.slane %v1206_v22, 2  ;;  %v1245_v25 = vadd.f32 %v1244_v23, %v1243_v21 }
 0x1a5   : > { %v1208_v26 = vadd.f32 %v1207_v24, %v1206_v22  ;;  %v1246_v36 = vrot.slane %v1245_v25, 2 }
 0x1a7   : > { %v1209_v27 = vrot.slane %v1208_v26, 1  ;;  %v1247_v28 = vadd.f32 %v1246_v36, %v1245_v25 }
 0x1a9   : > { %v1210_v29 = vadd.f32 %v1209_v27, %v1208_v26  ;;  %v1248_v30 = vrot.slane %v1247_v28, 1 }
 0x1ab   : > { %v1249_v31 = vadd.f32 %v1248_v30, %v1247_v28  ;;  %v1212_v32 = vmul.f32 %v1211_v37, %v1210_v29 }
 0x1ad   : > { %v1250_v33 = vmul.f32 %v1249_v31, %v1211_v37 }
 0x1af   : > { %v1252_v34 = vsel %vm1251_vm0, %v1212_v32, %v1250_v33 }
 0x1b0   : > { %1253 = vst [vmem:[%s535_s26] sm:$0x3] %v1252_v34 }
 0x1b1 PF: > { %s2580_s29 = sld [smem:[#allocation11_spill]]  ;;  %s2581_s15 = sld [smem:[#allocation12_spill]] }
 0x1b2   : > { %p25_p4 = scmp.ge.s32.totalorder %s2123_s18, 4   ;;  %s2582_s13 = smov %s2031_s14 }
 0x1b3   : > { %s2584_s16 = smov %s2123_s18 }
 0x1b4   :  { %27 = sbr.rel (!%p25_p4) target bundleno = 9 (0x9), region = 138 }
 0x1b7   : > { %s2583_s14 = smov %s2580_s29 }
 0x1bb   :  { %1290 = vsyncpa [#allocation3], 1 }
 0x1bc   :  { %1292 = vsyncpa [#allocation3 + $0x1], 1 }
 0x1bd   :  { %1293 = vsyncpa [#allocation7], 1 }
 0x1be   :  { %1295 = vsyncpa [#allocation7 + $0x1], 1 }
 0x1bf   :  { %1296 = vsyncpa [#allocation4], 1 }
 0x1c0   :  { %1298 = vsyncpa [#allocation4 + $0x1], 1 }

</bundles_post_ra>
